<compile_context>
chip_gen: v7x
topology: tpu7x:2x2x1
jax: 0.10.0
libtpu: 0.0.40
codegen_flags: <defaults>
</compile_context>

<pallas_src>
import jax
import jax.numpy as jnp
from jax import lax
from jax.experimental import pallas as pl
from jax.experimental.pallas import tpu as pltpu


def make_fused_kernel(num_features, card_offsets, n_hidden, card_pad, pad,
                      out_dim, bias_row0, compute_dtype):
    """Fused kernel: OR-accumulated multi-hot -> (T @ W1) matmul + ReLU ->
    remaining Linear+ReLU chain -> output Linear, true-width store."""

    def kernel(idx_ref, w_ref, o_ref):
        idx = idx_ref[...]                              # (tile_n, F) int32
        tile_n = idx.shape[0]

        # --- multi-hot over the global (offset) categorical id space --------
        # Feature id ranges are disjoint, so boolean OR accumulation is exact;
        # a single convert at the end keeps VALU work at ~2 ops/feature/vreg.
        lane = lax.broadcasted_iota(jnp.int32, (tile_n, card_pad), 1)
        hit = lane == (idx[:, 0:1] + card_offsets[0])
        for f in range(1, num_features):
            hit = jnp.logical_or(hit, lane == (idx[:, f:f + 1] + card_offsets[f]))
        onehot = hit.astype(compute_dtype)

        # --- embedding gather + first Linear fused (table premultiplied) ----
        x = jnp.dot(onehot, w_ref[0:card_pad, :],
                    preferred_element_type=jnp.float32)
        x = jnp.maximum(x + w_ref[bias_row0:bias_row0 + 1, :], 0.0)

        # --- remaining hidden Linear + ReLU chain (activations stay in vregs)
        for l in range(1, n_hidden):
            off = card_pad + (l - 1) * pad
            w = w_ref[off:off + pad, :]                 # static, tile-aligned
            b = w_ref[bias_row0 + l:bias_row0 + l + 1, :]
            x = jnp.maximum(
                jnp.dot(x.astype(compute_dtype), w,
                        preferred_element_type=jnp.float32) + b, 0.0)

        # --- output Linear, store only the true out_dim lanes ----------------
        off = card_pad + (n_hidden - 1) * pad
        wo = w_ref[off:off + pad, :]
        bo = w_ref[bias_row0 + n_hidden:bias_row0 + n_hidden + 1, :]
        y = jnp.dot(x.astype(compute_dtype), wo,
                    preferred_element_type=jnp.float32) + bo
        o_ref[...] = y[:, :out_dim]                     # (tile_n, out_dim)

    return kernel


def entity_embedding_forward(indices, embd_tables, hidden_params, out_params,
                             *, tile_n=256, param_dtype=jnp.float32):
    """Forward pass matching EntityEmbedding.forward (eval mode, use_bn=False,
    y_range=None).

    indices:       (N, F) int32 categorical ids
    embd_tables:   list of (cardinality_f, emb_dim_f) f32 tables
    hidden_params: list of (W (in,out), b (1,out)) f32 (transposed vs nn.Linear)
    out_params:    (W_out (in,out), b_out (1,out)) f32
    param_dtype:   f32 (exact) or bf16 (native MXU operands on v6e/v7x,
                   accumulation stays f32)
    """
    N, F = indices.shape
    cards = [int(t.shape[0]) for t in embd_tables]
    embs = [int(t.shape[1]) for t in embd_tables]
    total_card = sum(cards)
    conc = sum(embs)
    hidden_dims = [int(w.shape[1]) for w, _ in hidden_params]
    out_dim = int(out_params[0].shape[1])
    n_hidden = len(hidden_params)

    # Decoupled pads: multi-hot/table rows scale with total cardinality only,
    # layer blocks with the (tiny) layer widths.
    card_pad = 128 * pl.cdiv(total_card, 128)
    pad = 128 * pl.cdiv(max(hidden_dims + [out_dim]), 128)

    # --- block-diagonal table, premultiplied by the first Linear weight ------
    card_off, emb_off = [], []
    co = eo = 0
    for c, s in zip(cards, embs):
        card_off.append(co)
        emb_off.append(eo)
        co += c
        eo += s

    table = jnp.zeros((total_card, conc), jnp.float32)
    for f, tbl in enumerate(embd_tables):
        table = table.at[card_off[f]:card_off[f] + cards[f],
                         emb_off[f]:emb_off[f] + embs[f]].set(tbl.astype(jnp.float32))
    w1, b1 = hidden_params[0]
    tw1 = table @ w1.astype(jnp.float32)                       # (total_card, h1)
    tw1 = jnp.zeros((card_pad, pad), jnp.float32
                    ).at[:total_card, :hidden_dims[0]].set(tw1)

    # --- pack remaining weights AND biases into ONE resident slab ------------
    w_blocks = [tw1]
    b_rows = [jnp.zeros((pad,), jnp.float32).at[:hidden_dims[0]].set(b1.reshape(-1))]
    for w, b in list(hidden_params[1:]) + [out_params]:
        wp = jnp.zeros((pad, pad), jnp.float32).at[:w.shape[0], :w.shape[1]].set(w)
        bp = jnp.zeros((pad,), jnp.float32).at[:b.shape[-1]].set(b.reshape(-1))
        w_blocks.append(wp)
        b_rows.append(bp)
    bias_row0 = card_pad + n_hidden * pad          # table + (n_hidden-1) + out blocks
    nb = len(b_rows)                               # n_hidden + 1 bias rows
    nb_pad = 8 * pl.cdiv(nb, 8)
    bias_block = jnp.zeros((nb_pad, pad), jnp.float32).at[:nb].set(jnp.stack(b_rows))
    w_slab = jnp.concatenate(w_blocks + [bias_block], axis=0).astype(param_dtype)

    # --- batch padding / grid -------------------------------------------------
    n_tiles = pl.cdiv(N, tile_n)
    n_pad = n_tiles * tile_n
    idx_pad = jnp.zeros((n_pad, F), jnp.int32).at[:N].set(indices.astype(jnp.int32))

    kernel = make_fused_kernel(F, tuple(card_off), n_hidden, card_pad, pad,
                               out_dim, bias_row0, param_dtype)

    cost = pl.CostEstimate(
        flops=2 * n_pad * (card_pad * pad + n_hidden * pad * pad),
        transcendentals=0,
        bytes_accessed=(idx_pad.size * 4
                        + w_slab.size * w_slab.dtype.itemsize
                        + n_pad * out_dim * 4),
    )

    out = pl.pallas_call(
        kernel,
        out_shape=jax.ShapeDtypeStruct((n_pad, out_dim), jnp.float32),
        grid_spec=pltpu.PrefetchScalarGridSpec(
            num_scalar_prefetch=0,
            grid=(n_tiles,),
            in_specs=[
                pl.BlockSpec((tile_n, F), lambda i: (i, 0)),    # streamed idx tile
                pl.BlockSpec(w_slab.shape, lambda i: (0, 0)),   # resident params
            ],
            out_specs=pl.BlockSpec((tile_n, out_dim), lambda i: (i, 0)),
        ),
        compiler_params=pltpu.CompilerParams(
            dimension_semantics=("parallel",),
            vmem_limit_bytes=32 * 1024 * 1024,
        ),
        cost_estimate=cost,
    )(idx_pad, w_slab)

    return out[:N]


def reference_forward(indices, embd_tables, hidden_params, out_params):
    """Pure-JAX reference mirroring the PyTorch forward (eval mode)."""
    embedded = [jnp.take(t, indices[:, i], axis=0) for i, t in enumerate(embd_tables)]
    x = jnp.concatenate(embedded, axis=1).astype(jnp.float32)
    for w, b in hidden_params:
        x = jnp.maximum(x @ w + b, 0.0)
    wo, bo = out_params
    return x @ wo + bo


def init_params(key, embd_sizes, sz_hidden_layers, output_layer_sz):
    """Deterministic parameter init mirroring the PyTorch __init__."""
    keys = jax.random.split(key, 64)
    ki = iter(range(64))

    # Embedding tables: uniform(-1, 1), shape (cardinality, emb_dim)
    embd_tables = [
        jax.random.uniform(keys[next(ki)], (c, s), jnp.float32, minval=-1.0, maxval=1.0)
        for c, s in embd_sizes
    ]

    conc_embd = sum(s for _, s in embd_sizes)
    dims = [conc_embd] + list(sz_hidden_layers)

    def linear_init(kw, kb, fan_in, fan_out):
        # kaiming_normal_ (fan_in, gain=sqrt(2)) for weights; PyTorch default
        # uniform(-1/sqrt(fan_in), 1/sqrt(fan_in)) for biases.
        std = (2.0 / fan_in) ** 0.5
        w = std * jax.random.normal(kw, (fan_in, fan_out), jnp.float32)  # (in, out)
        bound = 1.0 / (fan_in ** 0.5)
        b = jax.random.uniform(kb, (1, fan_out), jnp.float32, minval=-bound, maxval=bound)
        return w, b

    hidden_params = []
    for i in range(len(dims) - 1):
        w, b = linear_init(keys[next(ki)], keys[next(ki)], dims[i], dims[i + 1])
        hidden_params.append((w, b))

    out_params = linear_init(keys[next(ki)], keys[next(ki)], dims[-1], output_layer_sz)
    return embd_tables, hidden_params, out_params


if __name__ == "__main__":
    # Module configuration (small, consistent with the forward pass)
    embd_sizes = [(10, 4), (8, 6), (12, 6)]   # (cardinality, emb_dim) per feature
    sz_hidden_layers = [32, 16]
    output_layer_sz = 8
    N = 1024                                   # 4 grid tiles of 256 rows each

    key = jax.random.PRNGKey(0)
    k_params, k_idx = jax.random.split(key)

    embd_tables, hidden_params, out_params = init_params(
        k_params, embd_sizes, sz_hidden_layers, output_layer_sz
    )

    # Input: (num_instances, num_categorical_features) int ids, each column
    # bounded by its feature cardinality (valid by construction).
    idx_keys = jax.random.split(k_idx, len(embd_sizes))
    cols = [
        jax.random.randint(idx_keys[i], (N,), 0, c, dtype=jnp.int32)
        for i, (c, _) in enumerate(embd_sizes)
    ]
    indices = jnp.stack(cols, axis=1)  # (N, F)

    ref = reference_forward(indices, embd_tables, hidden_params, out_params)

    # f32 parameter slab: bit-faithful module semantics, tight tolerance.
    out = entity_embedding_forward(indices, embd_tables, hidden_params, out_params,
                                   tile_n=256, param_dtype=jnp.float32)
    out = jax.block_until_ready(out)
    assert out.shape == (N, output_layer_sz)
    assert jnp.allclose(out, ref, atol=1e-4, rtol=1e-4), float(jnp.max(jnp.abs(out - ref)))

    # bf16 parameter slab (v6e/v7x MXU-native operands, f32 accumulation):
    # only the weights/biases are rounded, so a loose sanity bound suffices.
    out_bf16 = entity_embedding_forward(indices, embd_tables, hidden_params, out_params,
                                        tile_n=256, param_dtype=jnp.bfloat16)
    out_bf16 = jax.block_until_ready(out_bf16)
    assert out_bf16.shape == (N, output_layer_sz)
    assert float(jnp.max(jnp.abs(out_bf16 - ref))) < 0.25, \
        float(jnp.max(jnp.abs(out_bf16 - ref)))

    print("KERNEL_OK")
</pallas_src>

<mosaic_0001>
module attributes {stable_mosaic.version = 11 : i64} {
  func.func @kernel(%arg0: i32, %arg1: memref<256x3xi32, #tpu.memory_space<vmem>>, %arg2: memref<392x128xf32, #tpu.memory_space<vmem>>, %arg3: memref<256x8xf32, #tpu.memory_space<vmem>>) attributes {dimension_semantics = [#tpu.dimension_semantics<parallel>], iteration_bounds = array<i64: 4>, scalar_prefetch = 0 : i64, scratch_operands = 0 : i64, tpu.core_type = #tpu.core_type<tc>, window_params = [{transform_indices = @transform_0, window_bounds = array<i64: 256, 3>}, {pipeline_mode = #tpu.pipeline_mode<synchronous>, transform_indices = @transform_1, window_bounds = array<i64: 392, 128>}, {transform_indices = @transform_2, window_bounds = array<i64: 256, 8>}]} {
    %c0 = arith.constant 0 : index
    %c0_0 = arith.constant 0 : index
    %0 = vector.load %arg1[%c0, %c0_0] : memref<256x3xi32, #tpu.memory_space<vmem>>, vector<256x3xi32>
    %1 = tpu.iota {dimensions = array<i32: 1>} : vector<256x128xi32>
    %2 = vector.extract_strided_slice %0 {offsets = [0, 0], sizes = [256, 1], strides = [1, 1]} : vector<256x3xi32> to vector<256x1xi32>
    %c0_i32 = arith.constant 0 : i32
    %3 = vector.broadcast %c0_i32 : i32 to vector<256x1xi32>
    %4 = arith.addi %2, %3 : vector<256x1xi32>
    %5 = vector.broadcast %4 : vector<256x1xi32> to vector<256x128xi32>
    %6 = arith.cmpi eq, %1, %5 : vector<256x128xi32>
    %7 = vector.extract_strided_slice %0 {offsets = [0, 1], sizes = [256, 1], strides = [1, 1]} : vector<256x3xi32> to vector<256x1xi32>
    %c10_i32 = arith.constant 10 : i32
    %8 = vector.broadcast %c10_i32 : i32 to vector<256x1xi32>
    %9 = arith.addi %7, %8 : vector<256x1xi32>
    %10 = vector.broadcast %9 : vector<256x1xi32> to vector<256x128xi32>
    %11 = arith.cmpi eq, %1, %10 : vector<256x128xi32>
    %12 = arith.ori %6, %11 : vector<256x128xi1>
    %13 = vector.extract_strided_slice %0 {offsets = [0, 2], sizes = [256, 1], strides = [1, 1]} : vector<256x3xi32> to vector<256x1xi32>
    %c18_i32 = arith.constant 18 : i32
    %14 = vector.broadcast %c18_i32 : i32 to vector<256x1xi32>
    %15 = arith.addi %13, %14 : vector<256x1xi32>
    %16 = vector.broadcast %15 : vector<256x1xi32> to vector<256x128xi32>
    %17 = arith.cmpi eq, %1, %16 : vector<256x128xi32>
    %18 = arith.ori %12, %17 : vector<256x128xi1>
    %19 = arith.extui %18 : vector<256x128xi1> to vector<256x128xi32>
    %20 = arith.sitofp %19 : vector<256x128xi32> to vector<256x128xf32>
    %c0_1 = arith.constant 0 : index
    %c0_2 = arith.constant 0 : index
    %21 = vector.load %arg2[%c0_1, %c0_2] : memref<392x128xf32, #tpu.memory_space<vmem>>, vector<128x128xf32>
    %cst = arith.constant dense<0.000000e+00> : vector<256x128xf32>
    %22 = tpu.matmul %20, %21, %cst {dimension_numbers = #tpu.dot_dimension_numbers<[1], [0], [0], [1], [0, 0, 1, 1], [], []>} : vector<256x128xf32>, vector<128x128xf32>, vector<256x128xf32> -> vector<256x128xf32>
    %c384 = arith.constant 384 : index
    %c0_3 = arith.constant 0 : index
    %23 = vector.load %arg2[%c384, %c0_3] : memref<392x128xf32, #tpu.memory_space<vmem>>, vector<1x128xf32>
    %24 = vector.broadcast %23 : vector<1x128xf32> to vector<256x128xf32>
    %25 = arith.addf %22, %24 : vector<256x128xf32>
    %cst_4 = arith.constant 0.000000e+00 : f32
    %26 = vector.broadcast %cst_4 : f32 to vector<256x128xf32>
    %27 = arith.maximumf %25, %26 : vector<256x128xf32>
    %c128 = arith.constant 128 : index
    %c0_5 = arith.constant 0 : index
    %28 = vector.load %arg2[%c128, %c0_5] : memref<392x128xf32, #tpu.memory_space<vmem>>, vector<128x128xf32>
    %c385 = arith.constant 385 : index
    %c0_6 = arith.constant 0 : index
    %29 = vector.load %arg2[%c385, %c0_6] : memref<392x128xf32, #tpu.memory_space<vmem>>, vector<1x128xf32>
    %cst_7 = arith.constant dense<0.000000e+00> : vector<256x128xf32>
    %30 = tpu.matmul %27, %28, %cst_7 {dimension_numbers = #tpu.dot_dimension_numbers<[1], [0], [0], [1], [0, 0, 1, 1], [], []>} : vector<256x128xf32>, vector<128x128xf32>, vector<256x128xf32> -> vector<256x128xf32>
    %31 = vector.broadcast %29 : vector<1x128xf32> to vector<256x128xf32>
    %32 = arith.addf %30, %31 : vector<256x128xf32>
    %cst_8 = arith.constant 0.000000e+00 : f32
    %33 = vector.broadcast %cst_8 : f32 to vector<256x128xf32>
    %34 = arith.maximumf %32, %33 : vector<256x128xf32>
    %c256 = arith.constant 256 : index
    %c0_9 = arith.constant 0 : index
    %35 = vector.load %arg2[%c256, %c0_9] : memref<392x128xf32, #tpu.memory_space<vmem>>, vector<128x128xf32>
    %c386 = arith.constant 386 : index
    %c0_10 = arith.constant 0 : index
    %36 = vector.load %arg2[%c386, %c0_10] : memref<392x128xf32, #tpu.memory_space<vmem>>, vector<1x128xf32>
    %cst_11 = arith.constant dense<0.000000e+00> : vector<256x128xf32>
    %37 = tpu.matmul %34, %35, %cst_11 {dimension_numbers = #tpu.dot_dimension_numbers<[1], [0], [0], [1], [0, 0, 1, 1], [], []>} : vector<256x128xf32>, vector<128x128xf32>, vector<256x128xf32> -> vector<256x128xf32>
    %38 = vector.broadcast %36 : vector<1x128xf32> to vector<256x128xf32>
    %39 = arith.addf %37, %38 : vector<256x128xf32>
    %40 = vector.extract_strided_slice %39 {offsets = [0, 0], sizes = [256, 8], strides = [1, 1]} : vector<256x128xf32> to vector<256x8xf32>
    %c0_12 = arith.constant 0 : index
    %c0_13 = arith.constant 0 : index
    %41 = vector.load %arg3[%c0_12, %c0_13] : memref<256x8xf32, #tpu.memory_space<vmem>>, vector<256x8xf32>
    tpu.vector_store %arg3[%c0_12, %c0_13], %40 {strides = array<i32>} : memref<256x8xf32, #tpu.memory_space<vmem>>, vector<256x8xf32>,
    return
  }
  func.func @transform_0(%arg0: i32) -> (i32, i32) {
    %c0_i32 = arith.constant 0 : i32
    %c0_i32_0 = arith.constant 0 : i32
    return %arg0, %c0_i32 : i32, i32
  }
  func.func @transform_1(%arg0: i32) -> (i32, i32) {
    %c0_i32 = arith.constant 0 : i32
    %c0_i32_0 = arith.constant 0 : i32
    %c0_i32_1 = arith.constant 0 : i32
    return %c0_i32, %c0_i32_0 : i32, i32
  }
  func.func @transform_2(%arg0: i32) -> (i32, i32) {
    %c0_i32 = arith.constant 0 : i32
    %c0_i32_0 = arith.constant 0 : i32
    return %arg0, %c0_i32 : i32, i32
  }
}

</mosaic_0001>

<bundles_post_ra>
// kernel: tpu_custom_call.1
= control target key start
LH: loop header
LB: loop body
LE: loop exit
PB: predicated region body
PF: predicated region fallthrough
CT: control target
= control target key end

     0   :  { %s2313_s9 = smov 0   ;;  %s3020_s0 = inlined_call_operand.vmem [shape: s32[1024,3], index: 0, kind: input, shape index: {}]   ;;  %s3021_s1 = inlined_call_operand.vmem [shape: f32[392,128], index: 1, kind: input, shape index: {}]   ;;  %s3022_s2 = inlined_call_operand.vmem [shape: f32[1024,8], index: 2, kind: output, shape index: {}]  }
   0x1 LB: > { %s1648_s10 = sadd.s32 4294967295, %s2292_s9   ;;  %p1652_p0 = scmp.ge.s32.totalorder %s2292_s9, 1  ;;  %s2292_s9 = sphi %s2313_s9, %s12_s9  }
   0x2   : > { %p113_p1 = scmp.lt.s32.totalorder %s2292_s9, 5 }
   0x4   : > { %p114_p2 = pnand %p1652_p0, %p113_p1 }
   0x5   : > { %s1653_s11 = sshll.u32 (!%p114_p2), %s1648_s10, 5  ;;  %v2294_v0 = vmov (!%p114_p2), 0   ;;  %v2295_v5 = vmov (!%p114_p2), 1   ;;  %v2296_v8 = vmov (!%p114_p2), 2   ;;  %v757_v22 = vld [vmem:[%s3021_s1] sm:$0xff] (!%p114_p2)  ;;  %v758_v23 = vld [vmem:[%s3021_s1 + $0x8] sm:$0xff] (!%p114_p2) }
   0x6   : > { %117 = sbr.rel (%p114_p2) target bundleno = 1095 (0x447), region = 28  ;;  %2235 = vset.pattern.permute.xlu1 (!%p114_p2), %v2294_v0  ;;  %2234 = vset.pattern.permute.xlu0 (!%p114_p2), %v2294_v0  ;;  %p136_p3 = scmp.lt.s32.totalorder (!%p114_p2), %s1653_s11, 127  ;;  %v2110_v26 = vpack.c.bf16 (!%p114_p2), %v758_v23, %v757_v22  ;;  %v759_v27 = vld [vmem:[%s3021_s1 + $0x10] sm:$0xff] (!%p114_p2)  ;;  %v760_v28 = vld [vmem:[%s3021_s1 + $0x18] sm:$0xff] (!%p114_p2)  ;;  %v761_v32 = vld [vmem:[%s3021_s1 + $0x20] sm:$0xff] (!%p114_p2) }
   0x7   : > { %v2114_v30 = vpack.c.bf16 (!%p114_p2), %v760_v28, %v759_v27  ;;  %v762_v33 = vld [vmem:[%s3021_s1 + $0x28] sm:$0xff] (!%p114_p2)  ;;  %v763_v37 = vld [vmem:[%s3021_s1 + $0x30] sm:$0xff] (!%p114_p2)  ;;  %v764_v38 = vld [vmem:[%s3021_s1 + $0x38] sm:$0xff] (!%p114_p2) }
   0x8   : > { %2111 = vmatprep.subr.bf16.mxu0 (!%p114_p2), %v2110_v26  ;;  %2206 = vmatprep.subr.bf16.mxu1 (!%p114_p2), %v2110_v26  ;;  %v2118_v35 = vpack.c.bf16 (!%p114_p2), %v762_v33, %v761_v32  ;;  %v2122_v40 = vpack.c.bf16 (!%p114_p2), %v764_v38, %v763_v37  ;;  %v765_v42 = vld [vmem:[%s3021_s1 + $0x40] sm:$0xff] (!%p114_p2)  ;;  %v766_v43 = vld [vmem:[%s3021_s1 + $0x48] sm:$0xff] (!%p114_p2)  ;;  %v767_v47 = vld [vmem:[%s3021_s1 + $0x50] sm:$0xff] (!%p114_p2) }
   0x9   : > { %2113 = vmatpush3.bf16.msra.mxu0 (!%p114_p2), %v2110_v26  ;;  %2214 = vmatpush3.bf16.msra.mxu1 (!%p114_p2), %v2110_v26  ;;  %v2126_v45 = vpack.c.bf16 (!%p114_p2), %v766_v43, %v765_v42  ;;  %v768_v48 = vld [vmem:[%s3021_s1 + $0x58] sm:$0xff] (!%p114_p2)  ;;  %v769_v51 = vld [vmem:[%s3021_s1 + $0x60] sm:$0xff] (!%p114_p2)  ;;  %v770_v52 = vld [vmem:[%s3021_s1 + $0x68] sm:$0xff] (!%p114_p2) }
   0xa   : > { %2115 = vmatprep.subr.bf16.mxu0 (!%p114_p2), %v2114_v30  ;;  %2207 = vmatprep.subr.bf16.mxu1 (!%p114_p2), %v2114_v30  ;;  %v2130_v50 = vpack.c.bf16 (!%p114_p2), %v768_v48, %v767_v47  ;;  %v2134_v55 = vpack.c.bf16 (!%p114_p2), %v770_v52, %v769_v51  ;;  %v771_v56 = vld [vmem:[%s3021_s1 + $0x70] sm:$0xff] (!%p114_p2)  ;;  %v772_v57 = vld [vmem:[%s3021_s1 + $0x78] sm:$0xff] (!%p114_p2) }
   0xb   : > { %v2138_v59 = vpack.c.bf16 (!%p114_p2), %v772_v57, %v771_v56 }
   0xd   : > { %s3024_s11 = smov (!%p136_p3, %s1653_s11), 127  ;;  %2117 = vmatpush3.bf16.msra.mxu0 %v2114_v30  ;;  %2215 = vmatpush3.bf16.msra.mxu1 %v2114_v30 }
   0xe   : > { %s1654_s12 = sshll.u32 %s3024_s11, 3  ;;  %2119 = vmatprep.subr.bf16.mxu0 %v2118_v35  ;;  %2208 = vmatprep.subr.bf16.mxu1 %v2118_v35 }
   0xf   : > { %s2331_s15 = scalar_lea.vmem %s3020_s0, %s1654_s12  ;;  %s2919_s21 = scalar_lea.vmem %s3022_s2, %s1654_s12 }
  0x10   : > { %v2334_v1 = vld [vmem:[%s2331_s15 + $0x8] sm:$0xff]  ;;  %v147_v2 = vld [vmem:[%s2331_s15] sm:$0xff]  ;;  %v2342_v7 = vld [vmem:[%s2331_s15 + $0x18] sm:$0xff] }
  0x11   : > { %185 = vperm.xlu1 %2235, %v2334_v1   ;;  %182 = vperm.xlu0 %2234, %v147_v2   ;;  %v310_v3 = vadd.s32 10, %v2334_v1  ;;  %v309_v4 = vadd.s32 10, %v147_v2  ;;  %v501_v6 = vadd.s32 18, %v147_v2  ;;  %v2348_v9 = vld [vmem:[%s2331_s15 + $0x28] sm:$0xff]  ;;  %v149_v10 = vld [vmem:[%s2331_s15 + $0x10] sm:$0xff]  ;;  %v2354_v11 = vld [vmem:[%s2331_s15 + $0x38] sm:$0xff] }
  0x12   : > { %v311_v12 = vadd.s32 10, %v149_v10  ;;  %v2359_v13 = vld [vmem:[%s2331_s15 + $0x48] sm:$0xff]  ;;  %v312_v14 = vadd.s32 10, %v2342_v7  ;;  %v2364_v15 = vld [vmem:[%s2331_s15 + $0x58] sm:$0xff]  ;;  %v503_v16 = vadd.s32 18, %v149_v10  ;;  %v151_v18 = vld [vmem:[%s2331_s15 + $0x20] sm:$0xff]  ;;  %2121 = vmatpush3.bf16.msra.mxu0 %v2118_v35  ;;  %2216 = vmatpush3.bf16.msra.mxu1 %v2118_v35 }
  0x13   : > { %v2368_v17 = vld [vmem:[%s2331_s15 + $0x68] sm:$0xff]  ;;  %v2374_v19 = vld [vmem:[%s2331_s15 + $0x78] sm:$0xff]  ;;  %v313_v21 = vadd.s32 10, %v151_v18  ;;  %v314_v25 = vadd.s32 10, %v2348_v9  ;;  %v505_v31 = vadd.s32 18, %v151_v18  ;;  %v153_v36 = vld [vmem:[%s2331_s15 + $0x30] sm:$0xff]  ;;  %2123 = vmatprep.subr.bf16.mxu0 %v2122_v40  ;;  %2209 = vmatprep.subr.bf16.mxu1 %v2122_v40 }
  0x14   : > { %v2379_v20 = vld [vmem:[%s2331_s15 + $0x88] sm:$0xff]  ;;  %v2390_v24 = vld [vmem:[%s2331_s15 + $0x98] sm:$0xff]  ;;  %v315_v41 = vadd.s32 10, %v153_v36  ;;  %v316_v46 = vadd.s32 10, %v2354_v11  ;;  %v507_v54 = vadd.s32 18, %v153_v36  ;;  %v502_v58 = vadd.s32 18, %v2334_v1 }
  0x15   : > { %2237 = vset.pattern.permute.xlu1 %v2295_v5  ;;  %2236 = vset.pattern.permute.xlu0 %v2295_v5  ;;  %v2401_v29 = vld [vmem:[%s2331_s15 + $0xa8] sm:$0xff]  ;;  %v2412_v34 = vld [vmem:[%s2331_s15 + $0xb8] sm:$0xff]  ;;  %v155_v60 = vld [vmem:[%s2331_s15 + $0x40] sm:$0xff]  ;;  %v504_v61 = vadd.s32 18, %v2342_v7  ;;  %v506_v63 = vadd.s32 18, %v2348_v9  ;;  %v318_v1 = vadd.s32 10, %v2359_v13 }
  0x16   : > { %345 = vperm.xlu1 %2237, %v310_v3   ;;  %342 = vperm.xlu0 %2236, %v309_v4   ;;  %v2423_v39 = vld [vmem:[%s2331_s15 + $0xc8] sm:$0xff]  ;;  %v2434_v44 = vld [vmem:[%s2331_s15 + $0xd8] sm:$0xff]  ;;  %v317_v62 = vadd.s32 10, %v155_v60  ;;  %v508_v2 = vadd.s32 18, %v2354_v11  ;;  %v509_v3 = vadd.s32 18, %v155_v60  ;;  %v510_v4 = vadd.s32 18, %v2359_v13 }
  0x17   : > { %2125 = vmatpush3.bf16.msra.mxu0 %v2122_v40  ;;  %2217 = vmatpush3.bf16.msra.mxu1 %v2122_v40  ;;  %v2446_v49 = vld [vmem:[%s2331_s15 + $0xe8] sm:$0xff]  ;;  %v2456_v53 = vld [vmem:[%s2331_s15 + $0xf8] sm:$0xff]  ;;  %v322_v23 = vadd.s32 10, %v2368_v17  ;;  %v528_v26 = vadd.s32 18, %v2434_v44  ;;  %v161_v30 = vld [vmem:[%s2331_s15 + $0x70] sm:$0xff]  ;;  %v324_v40 = vadd.s32 10, %v2374_v19 }
  0x18   : > { %2127 = vmatprep.subr.bf16.mxu0 %v2126_v45  ;;  %2210 = vmatprep.subr.bf16.mxu1 %v2126_v45  ;;  %v530_v28 = vadd.s32 18, %v2446_v49  ;;  %v323_v35 = vadd.s32 10, %v161_v30  ;;  %v515_v43 = vadd.s32 18, %v161_v30  ;;  %v163_v48 = vld [vmem:[%s2331_s15 + $0x80] sm:$0xff]  ;;  %v326_v56 = vadd.s32 10, %v2379_v20 }
  0x19   : > { %v325_v52 = vadd.s32 10, %v163_v48 }
  0x1a   : > { %2238 = vset.pattern.permute.xlu1 %v2296_v8  ;;  %2241 = vset.pattern.permute.xlu0 %v2294_v0 }
  0x1b   : > { %534 = vperm.xlu1 %2238, %v501_v6   ;;  %191 = vperm.xlu0 %2241, %v2342_v7   ;;  %v512_v6 = vadd.s32 18, %v2364_v15  ;;  %v157_v7 = vld [vmem:[%s2331_s15 + $0x50] sm:$0xff] }
  0x1c   : > { %2129 = vmatpush3.bf16.msra.mxu0 %v2126_v45  ;;  %2218 = vmatpush3.bf16.msra.mxu1 %v2126_v45  ;;  %v2297_v45 = vmov 1.0  }
  0x1d   : > { %2131 = vmatprep.subr.bf16.mxu0 %v2130_v50  ;;  %2211 = vmatprep.subr.bf16.mxu1 %v2130_v50 }
  0x1f   : > { %2239 = vset.pattern.permute.xlu1 %v2294_v0  ;;  %197 = vperm.xlu0 %2241, %v2348_v9   ;;  %v514_v9 = vadd.s32 18, %v2368_v17 }
  0x20   : > { %188 = vperm.xlu1 %2239, %v149_v10   ;;  %2133 = vmatpush3.bf16.msra.mxu0 %v2130_v50  ;;  %v319_v10 = vadd.s32 10, %v157_v7 }
  0x21   : > { %2219 = vmatpush3.bf16.msra.mxu1 %v2130_v50  ;;  %2135 = vmatprep.subr.bf16.mxu0 %v2134_v55 }
  0x22   : > { %2212 = vmatprep.subr.bf16.mxu1 %v2134_v55 }
  0x23   : > { %203 = vperm.xlu0 %2241, %v2354_v11   ;;  %v516_v11 = vadd.s32 18, %v2374_v19 }
  0x24   : > { %2240 = vset.pattern.permute.xlu1 %v2295_v5  ;;  %2137 = vmatpush3.bf16.msra.mxu0 %v2134_v55 }
  0x25   : > { %348 = vperm.xlu1 %2240, %v311_v12   ;;  %2220 = vmatpush3.bf16.msra.mxu1 %v2134_v55  ;;  %v320_v12 = vadd.s32 10, %v2364_v15 }
  0x26   : > { %2139 = vmatprep.subr.bf16.mxu0 %v2138_v59  ;;  %2213 = vmatprep.subr.bf16.mxu1 %v2138_v59 }
  0x27   : > { %209 = vperm.xlu0 %2241, %v2359_v13   ;;  %v518_v13 = vadd.s32 18, %v2379_v20 }
  0x28   : > { %2141 = vmatpush3.bf16.msra.mxu0 %v2138_v59 }
  0x29   : > { %351 = vperm.xlu1 %2240, %v312_v14   ;;  %2221 = vmatpush3.bf16.msra.mxu1 %v2138_v59  ;;  %v511_v14 = vadd.s32 18, %v157_v7  ;;  %v517_v59 = vadd.s32 18, %v163_v48 }
  0x2b   : > { %215 = vperm.xlu0 %2241, %v2364_v15   ;;  %v524_v15 = vadd.s32 18, %v2412_v34 }
  0x2d   : > { %2242 = vset.pattern.permute.xlu1 %v2296_v8 }
  0x2e   : > { %540 = vperm.xlu1 %2242, %v503_v16   ;;  %v520_v16 = vadd.s32 18, %v2390_v24 }
  0x2f   : > { %221 = vperm.xlu0 %2241, %v2368_v17   ;;  %v532_v17 = vadd.s32 18, %v2456_v53 }
  0x32   : > { %2243 = vset.pattern.permute.xlu1 %v2294_v0 }
  0x33   : > { %194 = vperm.xlu1 %2243, %v151_v18   ;;  %227 = vperm.xlu0 %2241, %v2374_v19   ;;  %v159_v18 = vld [vmem:[%s2331_s15 + $0x60] sm:$0xff] }
  0x34   : > { %v321_v22 = vadd.s32 10, %v159_v18  ;;  %v513_v27 = vadd.s32 18, %v159_v18 }
  0x37   : > { %2244 = vset.pattern.permute.xlu1 %v2295_v5  ;;  %233 = vperm.xlu0 %2241, %v2379_v20  }
  0x38   : > { %354 = vperm.xlu1 %2244, %v313_v21   ;;  %v522_v21 = vadd.s32 18, %v2401_v29 }
  0x3b   : > { %239 = vperm.xlu0 %2241, %v2390_v24  }
  0x3c   : > { %357 = vperm.xlu1 %2244, %v314_v25   ;;  %v526_v25 = vadd.s32 18, %v2423_v39 }
  0x3f   : > { %245 = vperm.xlu0 %2241, %v2401_v29  }
  0x40   : > { %2245 = vset.pattern.permute.xlu1 %v2296_v8 }
  0x41   : > { %546 = vperm.xlu1 %2245, %v505_v31   ;;  %v179_v31 = vlaneseq }
  0x43   : > { %251 = vperm.xlu0 %2241, %v2412_v34  }
  0x45   : > { %2246 = vset.pattern.permute.xlu1 %v2294_v0 }
  0x46   : > { %200 = vperm.xlu1 %2246, %v153_v36   ;;  %v2502_v36 = vand.u32 127, %v179_v31 }
  0x47   : > { %257 = vperm.xlu0 %2241, %v2423_v39  }
  0x4a   : > { %2247 = vset.pattern.permute.xlu1 %v2295_v5 }
  0x4b   : > { %360 = vperm.xlu1 %2247, %v315_v41   ;;  %263 = vperm.xlu0 %2241, %v2434_v44  }
  0x4f   : > { %363 = vperm.xlu1 %2247, %v316_v46   ;;  %269 = vperm.xlu0 %2241, %v2446_v49  }
  0x53   : > { %2248 = vset.pattern.permute.xlu1 %v2296_v8  ;;  %275 = vperm.xlu0 %2241, %v2456_v53  }
  0x54   : > { %552 = vperm.xlu1 %2248, %v507_v54  }
  0x57   : > { %2284 = vset.pattern.permute.xlu0 %v2296_v8 }
  0x58   : > { %2249 = vset.pattern.permute.xlu1 %v2294_v0  ;;  %537 = vperm.xlu0 %2284, %v502_v58  }
  0x59   : > { %206 = vperm.xlu1 %2249, %v155_v60  }
  0x5c   : > { %543 = vperm.xlu0 %2284, %v504_v61  }
  0x5d   : > { %2250 = vset.pattern.permute.xlu1 %v2295_v5 }
  0x5e   : > { %366 = vperm.xlu1 %2250, %v317_v62   ;;  %v165_v62 = vld [vmem:[%s2331_s15 + $0x90] sm:$0xff] }
  0x5f   : > { %v327_v20 = vadd.s32 10, %v165_v62 }
  0x60   : > { %549 = vperm.xlu0 %2284, %v506_v63  }
  0x62   : > { %369 = vperm.xlu1 %2250, %v318_v1  }
  0x64   : > { %555 = vperm.xlu0 %2284, %v508_v2  }
  0x66   : > { %2251 = vset.pattern.permute.xlu1 %v2296_v8 }
  0x67   : > { %558 = vperm.xlu1 %2251, %v509_v3  }
  0x68   : > { %561 = vperm.xlu0 %2284, %v510_v4   ;;  %v328_v4 = vadd.s32 10, %v2390_v24 }
  0x6b   : > { %2252 = vset.pattern.permute.xlu1 %v2294_v0 }
  0x6c   : > { %212 = vperm.xlu1 %2252, %v157_v7   ;;  %567 = vperm.xlu0 %2284, %v512_v6  }
  0x70   : > { %2253 = vset.pattern.permute.xlu1 %v2295_v5  ;;  %573 = vperm.xlu0 %2284, %v514_v9  }
  0x71   : > { %372 = vperm.xlu1 %2253, %v319_v10   ;;  %v519_v10 = vadd.s32 18, %v165_v62 }
  0x74   : > { %579 = vperm.xlu0 %2284, %v516_v11  }
  0x75   : > { %375 = vperm.xlu1 %2253, %v320_v12  }
  0x78   : > { %585 = vperm.xlu0 %2284, %v518_v13   ;;  %v167_v13 = vld [vmem:[%s2331_s15 + $0xa0] sm:$0xff] }
  0x79   : > { %2254 = vset.pattern.permute.xlu1 %v2296_v8  ;;  %v329_v24 = vadd.s32 10, %v167_v13 }
  0x7a   : > { %564 = vperm.xlu1 %2254, %v511_v14  }
  0x7c   : > { %591 = vperm.xlu0 %2284, %v520_v16  }
  0x7e   : > { %2255 = vset.pattern.permute.xlu1 %v2294_v0 }
  0x7f   : > { %218 = vperm.xlu1 %2255, %v159_v18  }
  0x80   : > { %597 = vperm.xlu0 %2284, %v522_v21  }
  0x83   : > { %2256 = vset.pattern.permute.xlu1 %v2295_v5 }
  0x84   : > { %378 = vperm.xlu1 %2256, %v321_v22   ;;  %603 = vperm.xlu0 %2284, %v524_v15   ;;  %v330_v22 = vadd.s32 10, %v2401_v29 }
  0x88   : > { %381 = vperm.xlu1 %2256, %v322_v23   ;;  %609 = vperm.xlu0 %2284, %v526_v25   ;;  %v521_v25 = vadd.s32 18, %v167_v13 }
  0x8c   : > { %2257 = vset.pattern.permute.xlu1 %v2296_v8  ;;  %615 = vperm.xlu0 %2284, %v528_v26  }
  0x8d   : > { %570 = vperm.xlu1 %2257, %v513_v27  }
  0x90   : > { %v2498_v32 = vpop.permute.xlu1 %185  ;;  %v183_v33 = vpop.permute.xlu0 %182  ;;  %621 = vperm.xlu0 %2284, %v530_v28   ;;  %v169_v28 = vld [vmem:[%s2331_s15 + $0xb0] sm:$0xff] }
  0x91   : > { %2258 = vset.pattern.permute.xlu1 %v2294_v0  ;;  %vm277_vm0 = vcmp.eq.s32.totalorder %v2502_v36, %v183_v33  ;;  %vm278_vm7 = vcmp.eq.s32.totalorder %v2502_v36, %v2498_v32  ;;  %v331_v32 = vadd.s32 10, %v169_v28 }
  0x92   : > { %224 = vperm.xlu1 %2258, %v161_v30  }
  0x94   : > { %627 = vperm.xlu0 %2284, %v532_v17  }
  0x95   : > { %v2504_v37 = vpop.permute.xlu1 %345  ;;  %v343_v38 = vpop.permute.xlu0 %342 }
  0x96   : > { %2259 = vset.pattern.permute.xlu1 %v2295_v5  ;;  %vm437_vm1 = vcmp.eq.s32.totalorder %v2502_v36, %v343_v38  ;;  %vm438_vm5 = vcmp.eq.s32.totalorder %v2502_v36, %v2504_v37  ;;  %v523_v38 = vadd.s32 18, %v169_v28 }
  0x97   : > { %384 = vperm.xlu1 %2259, %v323_v35   ;;  %vm469_vm2 = vmor %vm277_vm0, %vm437_vm1  ;;  %v332_v35 = vadd.s32 10, %v2412_v34 }
  0x98   : > { %vm470_vm10 = vmor %vm278_vm7, %vm438_vm5 }
  0x9a   : > { %v535_v41 = vpop.permute.xlu1 %534  ;;  %v2510_v42 = vpop.permute.xlu0 %191 }
  0x9b   : > { %387 = vperm.xlu1 %2259, %v324_v40   ;;  %vm629_vm3 = vcmp.eq.s32.totalorder %v2502_v36, %v535_v41  ;;  %vm280_vm11 = vcmp.eq.s32.totalorder %v2502_v36, %v2510_v42  ;;  %v171_v41 = vld [vmem:[%s2331_s15 + $0xc0] sm:$0xff] }
  0x9c   : > { %vm661_vm4 = vmor %vm469_vm2, %vm629_vm3 }
  0x9d   : > { %1902 = vmatprep.mubr.msk.f32.mxu0 %vm661_vm4, %v2297_v45 }
  0x9e   : > { %v2514_v46 = vpop.permute.xlu0 %197 }
  0x9f   : > { %2260 = vset.pattern.permute.xlu1 %v2296_v8  ;;  %v2517_v47 = vpop.permute.xlu1 %188  ;;  %vm282_vm5 = vcmp.eq.s32.totalorder %v2502_v36, %v2514_v46 }
  0xa0   : > { %576 = vperm.xlu1 %2260, %v515_v43   ;;  %vm279_vm8 = vcmp.eq.s32.totalorder %v2502_v36, %v2517_v47  ;;  %v333_v43 = vadd.s32 10, %v171_v41  ;;  %v334_v47 = vadd.s32 10, %v2423_v39  ;;  %v525_v39 = vadd.s32 18, %v171_v41 }
  0xa2   : > { %v2519_v19 = vpop.permute.xlu0 %203 }
  0xa4   : > { %2261 = vset.pattern.permute.xlu1 %v2294_v0  ;;  %v349_v50 = vpop.permute.xlu1 %348 }
  0xa5   : > { %230 = vperm.xlu1 %2261, %v163_v48   ;;  %vm439_vm6 = vcmp.eq.s32.totalorder %v2502_v36, %v349_v50 }
  0xa6   : > { %v2523_v51 = vpop.permute.xlu0 %209  ;;  %vm471_vm12 = vmor %vm279_vm8, %vm439_vm6 }
  0xa8   : > { %v2525_v54 = vpop.permute.xlu1 %351 }
  0xa9   : > { %2262 = vset.pattern.permute.xlu1 %v2295_v5  ;;  %vm440_vm13 = vcmp.eq.s32.totalorder %v2502_v36, %v2525_v54 }
  0xaa   : > { %390 = vperm.xlu1 %2262, %v325_v52   ;;  %v2528_v55 = vpop.permute.xlu0 %215  ;;  %vm472_vm4 = vmor %vm280_vm11, %vm440_vm13 }
  0xad   : > { %v541_v57 = vpop.permute.xlu1 %540 }
  0xae   : > { %393 = vperm.xlu1 %2262, %v326_v56   ;;  %v2531_v58 = vpop.permute.xlu0 %221  ;;  %vm631_vm9 = vcmp.eq.s32.totalorder %v2502_v36, %v541_v57  ;;  %v336_v56 = vadd.s32 10, %v2434_v44 }
  0xaf   : > { %vm663_vm1 = vmor %vm471_vm12, %vm631_vm9 }
  0xb2   : > { %2263 = vset.pattern.permute.xlu1 %v2296_v8  ;;  %v2534_v60 = vpop.permute.xlu1 %194  ;;  %v2536_v61 = vpop.permute.xlu0 %227 }
  0xb3   : > { %582 = vperm.xlu1 %2263, %v517_v59   ;;  %vm281_vm2 = vcmp.eq.s32.totalorder %v2502_v36, %v2534_v60  ;;  %v175_v60 = vld [vmem:[%s2331_s15 + $0xe0] sm:$0xff] }
  0xb6   : > { %v2539_v63 = vpop.permute.xlu0 %233 }
  0xb7   : > { %2264 = vset.pattern.permute.xlu1 %v2294_v0  ;;  %v355_v1 = vpop.permute.xlu1 %354 }
  0xb8   : > { %236 = vperm.xlu1 %2264, %v165_v62   ;;  %vm441_vm15 = vcmp.eq.s32.totalorder %v2502_v36, %v355_v1  ;;  %v337_v1 = vadd.s32 10, %v175_v60 }
  0xb9   : > { %vm473_vm6 = vmor %vm281_vm2, %vm441_vm15 }
  0xba   : > { %v2542_v2 = vpop.permute.xlu0 %239 }
  0xbb   : > { %v2544_v3 = vpop.permute.xlu1 %357 }
  0xbc   : > { %2265 = vset.pattern.permute.xlu1 %v2295_v5  ;;  %vm442_vm7 = vcmp.eq.s32.totalorder %v2502_v36, %v2544_v3  ;;  %v338_v3 = vadd.s32 10, %v2446_v49 }
  0xbd   : > { %396 = vperm.xlu1 %2265, %v327_v20  }
  0xbe   : > { %v2548_v6 = vpop.permute.xlu0 %245 }
  0xc0   : > { %v547_v7 = vpop.permute.xlu1 %546 }
  0xc1   : > { %399 = vperm.xlu1 %2265, %v328_v4   ;;  %vm633_vm3 = vcmp.eq.s32.totalorder %v2502_v36, %v547_v7  ;;  %v1035_v7 = vld [vmem:[%s3021_s1 + $0x80] sm:$0xff] }
  0xc2   : > { %v2550_v9 = vpop.permute.xlu0 %251  ;;  %vm665_vm12 = vmor %vm473_vm6, %vm633_vm3  ;;  %vm286_vm6 = vcmp.eq.s32.totalorder %v2502_v36, %v2523_v51  ;;  %v173_v51 = vld [vmem:[%s2331_s15 + $0xd0] sm:$0xff] }
  0xc3   : > { %v335_v54 = vadd.s32 10, %v173_v51  ;;  %v527_v44 = vadd.s32 18, %v173_v51 }
  0xc5   : > { %2266 = vset.pattern.permute.xlu1 %v2296_v8  ;;  %v201_v11 = vpop.permute.xlu1 %200 }
  0xc6   : > { %588 = vperm.xlu1 %2266, %v519_v10   ;;  %v2553_v12 = vpop.permute.xlu0 %257  ;;  %vm283_vm11 = vcmp.eq.s32.totalorder %v2502_v36, %v201_v11  ;;  %v1036_v10 = vld [vmem:[%s3021_s1 + $0x88] sm:$0xff] }
  0xc7   : > { %v2142_v11 = vpack.c.bf16 %v1036_v10, %v1035_v7 }
  0xc9   : > { %2143 = vmatprep.subr.bf16.mxu1 %v2142_v11 }
  0xca   : > { %2267 = vset.pattern.permute.xlu1 %v2294_v0  ;;  %v361_v14 = vpop.permute.xlu1 %360  ;;  %v2557_v16 = vpop.permute.xlu0 %263 }
  0xcb   : > { %242 = vperm.xlu1 %2267, %v167_v13   ;;  %vm443_vm9 = vcmp.eq.s32.totalorder %v2502_v36, %v361_v14  ;;  %v177_v14 = vld [vmem:[%s2331_s15 + $0xf0] sm:$0xff] }
  0xcc   : > { %vm475_vm15 = vmor %vm283_vm11, %vm443_vm9 }
  0xce   : > { %v2559_v18 = vpop.permute.xlu1 %363  ;;  %v2561_v21 = vpop.permute.xlu0 %269 }
  0xcf   : > { %2268 = vset.pattern.permute.xlu1 %v2295_v5  ;;  %vm444_vm2 = vcmp.eq.s32.totalorder %v2502_v36, %v2559_v18  ;;  %v339_v18 = vadd.s32 10, %v177_v14 }
  0xd0   : > { %402 = vperm.xlu1 %2268, %v329_v24  }
  0xd2   : > { %v2565_v15 = vpop.permute.xlu0 %275 }
  0xd3   : > { %v553_v23 = vpop.permute.xlu1 %552 }
  0xd4   : > { %405 = vperm.xlu1 %2268, %v330_v22   ;;  %vm635_vm13 = vcmp.eq.s32.totalorder %v2502_v36, %v553_v23  ;;  %v340_v23 = vadd.s32 10, %v2456_v53  ;;  %v531_v53 = vadd.s32 18, %v177_v14 }
  0xd7   : > { %v538_v29 = vpop.permute.xlu0 %537 }
  0xd8   : > { %vm630_vm14 = vcmp.eq.s32.totalorder %v2502_v36, %v538_v29  ;;  %2269 = vset.pattern.permute.xlu1 %v2296_v8  ;;  %v207_v26 = vpop.permute.xlu1 %206  ;;  %v1038_v29 = vld [vmem:[%s3021_s1 + $0x98] sm:$0xff] }
  0xd9   : > { %vm662_vm0 = vmor %vm470_vm10, %vm630_vm14  ;;  %594 = vperm.xlu1 %2269, %v521_v25  }
  0xda   : > { %1903 = vmatmul.mubr.msk.f32.vlgmr.msra.gmra.mrb[0].mxu0 %vm662_vm0, %v2297_v45  ;;  %vm474_vm14 = vmor %vm282_vm5, %vm442_vm7 }
  0xdb   : > { %1905 = vmatprep.mubr.msk.f32.mxu0 %vm663_vm1, %v2297_v45  ;;  %v544_v27 = vpop.permute.xlu0 %543  ;;  %vm284_vm1 = vcmp.eq.s32.totalorder %v2502_v36, %v2519_v19 }
  0xdc   : > { %vm632_vm8 = vcmp.eq.s32.totalorder %v2502_v36, %v544_v27  ;;  %v1040_v27 = vld [vmem:[%s3021_s1 + $0xa8] sm:$0xff] }
  0xdd   : > { %vm664_vm10 = vmor %vm472_vm4, %vm632_vm8  ;;  %2270 = vset.pattern.permute.xlu1 %v2294_v0  ;;  %v367_v30 = vpop.permute.xlu1 %366 }
  0xde   : > { %248 = vperm.xlu1 %2270, %v169_v28   ;;  %1906 = vmatmul.mubr.msk.f32.gmra.mrb[2].mxu0 %vm664_vm10, %v2297_v45  ;;  %vm667_vm4 = vmor %vm475_vm15, %vm635_vm13  ;;  %vm445_vm5 = vcmp.eq.s32.totalorder %v2502_v36, %v367_v30  ;;  %vm285_vm10 = vcmp.eq.s32.totalorder %v2502_v36, %v207_v26  ;;  %v1039_v26 = vld [vmem:[%s3021_s1 + $0xa0] sm:$0xff] }
  0xdf   : > { %1908 = vmatprep.mubr.msk.f32.mxu0 %vm665_vm12, %v2297_v45  ;;  %v550_v31 = vpop.permute.xlu0 %549  ;;  %vm476_vm8 = vmor %vm284_vm1, %vm444_vm2  ;;  %vm288_vm2 = vcmp.eq.s32.totalorder %v2502_v36, %v2528_v55  ;;  %v2150_v30 = vpack.c.bf16 %v1040_v27, %v1039_v26 }
  0xe0   : > { %vm634_vm0 = vcmp.eq.s32.totalorder %v2502_v36, %v550_v31  ;;  %vm477_vm11 = vmor %vm285_vm10, %vm445_vm5  ;;  %v1041_v31 = vld [vmem:[%s3021_s1 + $0xb0] sm:$0xff] }
  0xe1   : > { %vm666_vm3 = vmor %vm474_vm14, %vm634_vm0  ;;  %v370_v33 = vpop.permute.xlu1 %369 }
  0xe2   : > { %2271 = vset.pattern.permute.xlu1 %v2295_v5  ;;  %1909 = vmatmul.mubr.msk.f32.gmra.mrb[4].mxu0 %vm666_vm3, %v2297_v45  ;;  %vm446_vm7 = vcmp.eq.s32.totalorder %v2502_v36, %v370_v33 }
  0xe3   : > { %408 = vperm.xlu1 %2271, %v331_v32   ;;  %1911 = vmatprep.mubr.msk.f32.mxu0 %vm667_vm4, %v2297_v45  ;;  %v556_v17 = vpop.permute.xlu0 %555  ;;  %vm478_vm13 = vmor %vm286_vm6, %vm446_vm7  ;;  %v1042_v32 = vld [vmem:[%s3021_s1 + $0xb8] sm:$0xff] }
  0xe4   : > { %vm636_vm9 = vcmp.eq.s32.totalorder %v2502_v36, %v556_v17  ;;  %v2154_v17 = vpack.c.bf16 %v1042_v32, %v1041_v31 }
  0xe5   : > { %vm668_vm12 = vmor %vm476_vm8, %vm636_vm9 }
  0xe6   : > { %v559_v37 = vpop.permute.xlu1 %558  ;;  %1912 = vmatmul.mubr.msk.f32.gmra.mrb[6].mxu0 %vm668_vm12, %v2297_v45 }
  0xe7   : > { %vm637_vm14 = vcmp.eq.s32.totalorder %v2502_v36, %v559_v37  ;;  %411 = vperm.xlu1 %2271, %v332_v35   ;;  %v562_v34 = vpop.permute.xlu0 %561  ;;  %v1044_v35 = vld [vmem:[%s3021_s1 + $0xc8] sm:$0xff] }
  0xe8   : > { %vm669_vm15 = vmor %vm477_vm11, %vm637_vm14  ;;  %vm638_vm0 = vcmp.eq.s32.totalorder %v2502_v36, %v562_v34  ;;  %vm290_vm11 = vcmp.eq.s32.totalorder %v2502_v36, %v2531_v58 }
  0xe9   : > { %vm670_vm1 = vmor %vm478_vm13, %vm638_vm0  ;;  %1914 = vmatprep.mubr.msk.f32.mxu0 %vm669_vm15, %v2297_v45 }
  0xea   : > { %1915 = vmatmul.mubr.msk.f32.gmra.mrb[8].mxu0 %vm670_vm1, %v2297_v45 }
  0xeb   : > { %2272 = vset.pattern.permute.xlu1 %v2296_v8  ;;  %v213_v40 = vpop.permute.xlu1 %212  ;;  %v568_v19 = vpop.permute.xlu0 %567 }
  0xec   : > { %600 = vperm.xlu1 %2272, %v523_v38   ;;  %vm287_vm5 = vcmp.eq.s32.totalorder %v2502_v36, %v213_v40  ;;  %vm640_vm7 = vcmp.eq.s32.totalorder %v2502_v36, %v568_v19  ;;  %v1045_v38 = vld [vmem:[%s3021_s1 + $0xd0] sm:$0xff]  ;;  %v1046_v40 = vld [vmem:[%s3021_s1 + $0xd8] sm:$0xff] }
  0xed   : > { %v1049_v19 = vld [vmem:[%s3021_s1 + $0xf0] sm:$0xff] }
  0xef   : > { %v574_v57 = vpop.permute.xlu0 %573 }
  0xf0   : > { %2273 = vset.pattern.permute.xlu1 %v2294_v0  ;;  %v373_v42 = vpop.permute.xlu1 %372  ;;  %vm642_vm1 = vcmp.eq.s32.totalorder %v2502_v36, %v574_v57 }
  0xf1   : > { %254 = vperm.xlu1 %2273, %v171_v41   ;;  %vm447_vm4 = vcmp.eq.s32.totalorder %v2502_v36, %v373_v42  ;;  %v2162_v42 = vpack.c.bf16 %v1046_v40, %v1045_v38 }
  0xf2   : > { %vm479_vm8 = vmor %vm287_vm5, %vm447_vm4 }
  0xf3   : > { %v580_v4 = vpop.permute.xlu0 %579 }
  0xf4   : > { %v376_v46 = vpop.permute.xlu1 %375 }
  0xf5   : > { %2274 = vset.pattern.permute.xlu1 %v2295_v5  ;;  %vm448_vm3 = vcmp.eq.s32.totalorder %v2502_v36, %v376_v46  ;;  %v1047_v46 = vld [vmem:[%s3021_s1 + $0xe0] sm:$0xff] }
  0xf6   : > { %414 = vperm.xlu1 %2274, %v333_v43   ;;  %vm480_vm6 = vmor %vm288_vm2, %vm448_vm3 }
  0xf7   : > { %vm672_vm12 = vmor %vm480_vm6, %vm640_vm7  ;;  %vm292_vm6 = vcmp.eq.s32.totalorder %v2502_v36, %v2536_v61  ;;  %v529_v61 = vadd.s32 18, %v175_v60  ;;  %v586_v25 = vpop.permute.xlu0 %585 }
  0xf9   : > { %v565_v48 = vpop.permute.xlu1 %564 }
  0xfa   : > { %vm639_vm9 = vcmp.eq.s32.totalorder %v2502_v36, %v565_v48  ;;  %417 = vperm.xlu1 %2274, %v334_v47   ;;  %v1050_v48 = vld [vmem:[%s3021_s1 + $0xf8] sm:$0xff] }
  0xfb   : > { %vm671_vm10 = vmor %vm479_vm8, %vm639_vm9  ;;  %v592_v41 = vpop.permute.xlu0 %591 }
  0xfc   : > { %1917 = vmatprep.mubr.msk.f32.mxu0 %vm671_vm10, %v2297_v45 }
  0xfd   : > { %1918 = vmatmul.mubr.msk.f32.gmra.mrb[10].mxu0 %vm672_vm12, %v2297_v45  ;;  %vm644_vm12 = vcmp.eq.s32.totalorder %v2502_v36, %v580_v4 }
  0xfe   : > { %2275 = vset.pattern.permute.xlu1 %v2296_v8  ;;  %v219_v50 = vpop.permute.xlu1 %218 }
  0xff   : > { %606 = vperm.xlu1 %2275, %v525_v39   ;;  %vm289_vm15 = vcmp.eq.s32.totalorder %v2502_v36, %v219_v50  ;;  %v2170_v50 = vpack.c.bf16 %v1050_v48, %v1049_v19 }
 0x103   : > { %2276 = vset.pattern.permute.xlu1 %v2294_v0  ;;  %v379_v52 = vpop.permute.xlu1 %378 }
 0x104   : > { %260 = vperm.xlu1 %2276, %v173_v51   ;;  %vm449_vm14 = vcmp.eq.s32.totalorder %v2502_v36, %v379_v52 }
 0x105   : > { %vm481_vm2 = vmor %vm289_vm15, %vm449_vm14 }
 0x107   : > { %v382_v55 = vpop.permute.xlu1 %381 }
 0x108   : > { %2277 = vset.pattern.permute.xlu1 %v2295_v5  ;;  %vm450_vm13 = vcmp.eq.s32.totalorder %v2502_v36, %v382_v55 }
 0x109   : > { %420 = vperm.xlu1 %2277, %v335_v54   ;;  %vm482_vm0 = vmor %vm290_vm11, %vm450_vm13  ;;  %v598_v54 = vpop.permute.xlu0 %597 }
 0x10a   : > { %vm674_vm5 = vmor %vm482_vm0, %vm642_vm1  ;;  %vm294_vm0 = vcmp.eq.s32.totalorder %v2502_v36, %v2539_v63 }
 0x10c   : > { %v571_v59 = vpop.permute.xlu1 %570 }
 0x10d   : > { %vm641_vm3 = vcmp.eq.s32.totalorder %v2502_v36, %v571_v59  ;;  %423 = vperm.xlu1 %2277, %v336_v56  }
 0x10e   : > { %vm673_vm4 = vmor %vm481_vm2, %vm641_vm3 }
 0x10f   : > { %1920 = vmatprep.mubr.msk.f32.mxu0 %vm673_vm4, %v2297_v45 }
 0x110   : > { %1921 = vmatmul.mubr.msk.f32.gmra.mrb[12].mxu0 %vm674_vm5, %v2297_v45  ;;  %vm646_vm5 = vcmp.eq.s32.totalorder %v2502_v36, %v586_v25  ;;  %v2781_v25 = vld [vmem:[%s3021_s1 + $0x180] ss:$0 sm:$0xff] }
 0x111   : > { %2278 = vset.pattern.permute.xlu1 %v2296_v8  ;;  %v225_v58 = vpop.permute.xlu1 %224 }
 0x112   : > { %612 = vperm.xlu1 %2278, %v527_v44   ;;  %vm291_vm9 = vcmp.eq.s32.totalorder %v2502_v36, %v225_v58 }
 0x116   : > { %2279 = vset.pattern.permute.xlu1 %v2294_v0  ;;  %v385_v62 = vpop.permute.xlu1 %384 }
 0x117   : > { %266 = vperm.xlu1 %2279, %v175_v60   ;;  %vm451_vm8 = vcmp.eq.s32.totalorder %v2502_v36, %v385_v62 }
 0x118   : > { %vm483_vm11 = vmor %vm291_vm9, %vm451_vm8 }
 0x11a   : > { %v388_v20 = vpop.permute.xlu1 %387 }
 0x11b   : > { %2280 = vset.pattern.permute.xlu1 %v2295_v5  ;;  %vm452_vm7 = vcmp.eq.s32.totalorder %v2502_v36, %v388_v20 }
 0x11c   : > { %426 = vperm.xlu1 %2280, %v337_v1   ;;  %vm484_vm10 = vmor %vm292_vm6, %vm452_vm7 }
 0x11d   : > { %vm676_vm15 = vmor %vm484_vm10, %vm644_vm12  ;;  %vm296_vm10 = vcmp.eq.s32.totalorder %v2502_v36, %v2542_v2  ;;  %v1048_v2 = vld [vmem:[%s3021_s1 + $0xe8] sm:$0xff] }
 0x11e   : > { %v2166_v47 = vpack.c.bf16 %v1048_v2, %v1047_v46 }
 0x11f   : > { %v577_v49 = vpop.permute.xlu1 %576 }
 0x120   : > { %vm643_vm13 = vcmp.eq.s32.totalorder %v2502_v36, %v577_v49  ;;  %429 = vperm.xlu1 %2280, %v338_v3  }
 0x121   : > { %vm675_vm14 = vmor %vm483_vm11, %vm643_vm13 }
 0x122   : > { %1923 = vmatprep.mubr.msk.f32.mxu0 %vm675_vm14, %v2297_v45 }
 0x123   : > { %1924 = vmatmul.mubr.msk.f32.gmra.mrb[14].mxu0 %vm676_vm15, %v2297_v45  ;;  %vm648_vm15 = vcmp.eq.s32.totalorder %v2502_v36, %v592_v41 }
 0x124   : > { %2281 = vset.pattern.permute.xlu1 %v2296_v8  ;;  %v231_v13 = vpop.permute.xlu1 %230 }
 0x125   : > { %618 = vperm.xlu1 %2281, %v529_v61   ;;  %vm293_vm3 = vcmp.eq.s32.totalorder %v2502_v36, %v231_v13 }
 0x129   : > { %2282 = vset.pattern.permute.xlu1 %v2294_v0  ;;  %v391_v24 = vpop.permute.xlu1 %390  ;;  %v1037_v0 = vld [vmem:[%s3021_s1 + $0x90] sm:$0xff] }
 0x12a   : > { %272 = vperm.xlu1 %2282, %v177_v14   ;;  %vm453_vm2 = vcmp.eq.s32.totalorder %v2502_v36, %v391_v24  ;;  %v2146_v63 = vpack.c.bf16 %v1038_v29, %v1037_v0 }
 0x12b   : > { %vm485_vm7 = vmor %vm293_vm3, %vm453_vm2 }
 0x12d   : > { %v394_v22 = vpop.permute.xlu1 %393 }
 0x12e   : > { %2283 = vset.pattern.permute.xlu1 %v2295_v5  ;;  %vm454_vm1 = vcmp.eq.s32.totalorder %v2502_v36, %v394_v22 }
 0x12f   : > { %432 = vperm.xlu1 %2283, %v339_v18   ;;  %vm486_vm4 = vmor %vm294_vm0, %vm454_vm1 }
 0x130   : > { %vm678_vm9 = vmor %vm486_vm4, %vm646_vm5 }
 0x132   : > { %v583_v5 = vpop.permute.xlu1 %582 }
 0x133   : > { %vm645_vm6 = vcmp.eq.s32.totalorder %v2502_v36, %v583_v5  ;;  %435 = vperm.xlu1 %2283, %v340_v23  }
 0x134   : > { %vm677_vm8 = vmor %vm485_vm7, %vm645_vm6  ;;  %vm298_vm6 = vcmp.eq.s32.totalorder %v2502_v36, %v2548_v6  ;;  %v604_v6 = vpop.permute.xlu0 %603 }
 0x135   : > { %1926 = vmatprep.mubr.msk.f32.mxu1 %vm677_vm8, %v2297_v45 }
 0x136   : > { %1927 = vmatmul.mubr.msk.f32.vlgmr.msra.gmra.mrb[0].mxu1 %vm678_vm9, %v2297_v45  ;;  %vm650_vm9 = vcmp.eq.s32.totalorder %v2502_v36, %v598_v54 }
 0x137   : > { %2285 = vset.pattern.permute.xlu1 %v2296_v8  ;;  %v237_v28 = vpop.permute.xlu1 %236  ;;  %2145 = vmatpush3.bf16.msra.mxu1 %v2142_v11  ;;  %v1043_v8 = vld [vmem:[%s3021_s1 + $0xc0] sm:$0xff] }
 0x138   : > { %624 = vperm.xlu1 %2285, %v531_v53   ;;  %2147 = vmatprep.subr.bf16.mxu1 %v2146_v63  ;;  %v2158_v34 = vpack.c.bf16 %v1044_v35, %v1043_v8  ;;  %vm295_vm13 = vcmp.eq.s32.totalorder %v2502_v36, %v237_v28 }
 0x13b   : > { %2149 = vmatpush3.bf16.msra.mxu1 %v2146_v63 }
 0x13c   : > { %v397_v33 = vpop.permute.xlu1 %396  ;;  %2151 = vmatprep.subr.bf16.mxu1 %v2150_v30 }
 0x13d   : > { %vm455_vm11 = vcmp.eq.s32.totalorder %v2502_v36, %v397_v33 }
 0x13e   : > { %vm487_vm0 = vmor %vm295_vm13, %vm455_vm11 }
 0x13f   : > { %2153 = vmatpush3.bf16.msra.mxu1 %v2150_v30 }
 0x140   : > { %v400_v37 = vpop.permute.xlu1 %399  ;;  %2155 = vmatprep.subr.bf16.mxu1 %v2154_v17 }
 0x141   : > { %vm456_vm12 = vcmp.eq.s32.totalorder %v2502_v36, %v400_v37 }
 0x142   : > { %vm488_vm14 = vmor %vm296_vm10, %vm456_vm12 }
 0x143   : > { %2157 = vmatpush3.bf16.msra.mxu1 %v2154_v17  ;;  %vm680_vm3 = vmor %vm488_vm14, %vm648_vm15 }
 0x144   : > { %2159 = vmatprep.subr.bf16.mxu1 %v2158_v34 }
 0x145   : > { %v589_v43 = vpop.permute.xlu1 %588 }
 0x146   : > { %vm647_vm1 = vcmp.eq.s32.totalorder %v2502_v36, %v589_v43 }
 0x147   : > { %vm679_vm2 = vmor %vm487_vm0, %vm647_vm1  ;;  %2161 = vmatpush3.bf16.msra.mxu1 %v2158_v34  ;;  %vm300_vm0 = vcmp.eq.s32.totalorder %v2502_v36, %v2550_v9  ;;  %v610_v9 = vpop.permute.xlu0 %609 }
 0x148   : > { %1929 = vmatprep.mubr.msk.f32.mxu1 %vm679_vm2, %v2297_v45  ;;  %2163 = vmatprep.subr.bf16.mxu1 %v2162_v42 }
 0x149   : > { %1930 = vmatmul.mubr.msk.f32.gmra.mrb[2].mxu1 %vm680_vm3, %v2297_v45  ;;  %vm652_vm3 = vcmp.eq.s32.totalorder %v2502_v36, %v604_v6 }
 0x14a   : > { %v243_v39 = vpop.permute.xlu1 %242 }
 0x14b   : > { %2165 = vmatpush3.bf16.msra.mxu1 %v2162_v42  ;;  %vm297_vm7 = vcmp.eq.s32.totalorder %v2502_v36, %v243_v39  ;;  %v616_v7 = vpop.permute.xlu0 %615 }
 0x14c   : > { %2167 = vmatprep.subr.bf16.mxu1 %v2166_v47 }
 0x14f   : > { %v403_v51 = vpop.permute.xlu1 %402  ;;  %2169 = vmatpush3.bf16.msra.mxu1 %v2166_v47  ;;  %v622_v61 = vpop.permute.xlu0 %621 }
 0x150   : > { %2171 = vmatprep.subr.bf16.mxu1 %v2170_v50  ;;  %vm457_vm5 = vcmp.eq.s32.totalorder %v2502_v36, %v403_v51 }
 0x151   : > { %vm489_vm10 = vmor %vm297_vm7, %vm457_vm5 }
 0x153   : > { %v406_v52 = vpop.permute.xlu1 %405  ;;  %2173 = vmatpush3.bf16.msra.mxu1 %v2170_v50  ;;  %v628_v29 = vpop.permute.xlu0 %627 }
 0x154   : > { %vm458_vm4 = vcmp.eq.s32.totalorder %v2502_v36, %v406_v52 }
 0x155   : > { %vm490_vm8 = vmor %vm298_vm6, %vm458_vm4 }
 0x156   : > { %vm682_vm13 = vmor %vm490_vm8, %vm650_vm9 }
 0x158   : > { %v595_v55 = vpop.permute.xlu1 %594 }
 0x159   : > { %vm649_vm12 = vcmp.eq.s32.totalorder %v2502_v36, %v595_v55 }
 0x15a   : > { %vm681_vm11 = vmor %vm489_vm10, %vm649_vm12  ;;  %vm302_vm10 = vcmp.eq.s32.totalorder %v2502_v36, %v2553_v12 }
 0x15b   : > { %1932 = vmatprep.mubr.msk.f32.mxu1 %vm681_vm11, %v2297_v45  ;;  %vm654_vm11 = vcmp.eq.s32.totalorder %v2502_v36, %v610_v9 }
 0x15c   : > { %1933 = vmatmul.mubr.msk.f32.gmra.mrb[4].mxu1 %vm682_vm13, %v2297_v45 }
 0x15d   : > { %v249_v56 = vpop.permute.xlu1 %248 }
 0x15e   : > { %vm299_vm1 = vcmp.eq.s32.totalorder %v2502_v36, %v249_v56 }
 0x162   : > { %v409_v57 = vpop.permute.xlu1 %408 }
 0x163   : > { %vm459_vm15 = vcmp.eq.s32.totalorder %v2502_v36, %v409_v57 }
 0x164   : > { %vm491_vm4 = vmor %vm299_vm1, %vm459_vm15 }
 0x166   : > { %v412_v59 = vpop.permute.xlu1 %411 }
 0x167   : > { %vm460_vm14 = vcmp.eq.s32.totalorder %v2502_v36, %v412_v59 }
 0x168   : > { %vm492_vm2 = vmor %vm300_vm0, %vm460_vm14 }
 0x169   : > { %vm684_vm7 = vmor %vm492_vm2, %vm652_vm3 }
 0x16b   : > { %v601_v44 = vpop.permute.xlu1 %600 }
 0x16c   : > { %vm651_vm5 = vcmp.eq.s32.totalorder %v2502_v36, %v601_v44  ;;  %v1313_v44 = vld [vmem:[%s3021_s1 + $0x100] sm:$0xff] }
 0x16d   : > { %vm683_vm6 = vmor %vm491_vm4, %vm651_vm5  ;;  %vm304_vm4 = vcmp.eq.s32.totalorder %v2502_v36, %v2557_v16 }
 0x16e   : > { %1935 = vmatprep.mubr.msk.f32.mxu1 %vm683_vm6, %v2297_v45 }
 0x16f   : > { %1936 = vmatmul.mubr.msk.f32.gmra.mrb[6].mxu1 %vm684_vm7, %v2297_v45 }
 0x170   : > { %v255_v58 = vpop.permute.xlu1 %254 }
 0x171   : > { %vm301_vm12 = vcmp.eq.s32.totalorder %v2502_v36, %v255_v58  ;;  %v1314_v58 = vld [vmem:[%s3021_s1 + $0x108] sm:$0xff] }
 0x175   : > { %v415_v60 = vpop.permute.xlu1 %414 }
 0x176   : > { %vm461_vm9 = vcmp.eq.s32.totalorder %v2502_v36, %v415_v60  ;;  %v2174_v60 = vpack.c.bf16 %v1314_v58, %v1313_v44 }
 0x177   : > { %vm493_vm14 = vmor %vm301_vm12, %vm461_vm9  ;;  %vm656_vm9 = vcmp.eq.s32.totalorder %v2502_v36, %v616_v7  ;;  %v1316_v7 = vld [vmem:[%s3021_s1 + $0x118] sm:$0xff] }
 0x178   : > { %2175 = vmatprep.subr.bf16.mxu0 %v2174_v60 }
 0x179   : > { %v418_v62 = vpop.permute.xlu1 %417  ;;  %2177 = vmatpush3.bf16.msra.mxu0 %v2174_v60 }
 0x17a   : > { %vm462_vm8 = vcmp.eq.s32.totalorder %v2502_v36, %v418_v62 }
 0x17b   : > { %vm494_vm13 = vmor %vm302_vm10, %vm462_vm8 }
 0x17c   : > { %vm686_vm1 = vmor %vm494_vm13, %vm654_vm11 }
 0x17e   : > { %v607_v1 = vpop.permute.xlu1 %606 }
 0x17f   : > { %vm653_vm15 = vcmp.eq.s32.totalorder %v2502_v36, %v607_v1 }
 0x180   : > { %vm685_vm0 = vmor %vm493_vm14, %vm653_vm15  ;;  %vm306_vm14 = vcmp.eq.s32.totalorder %v2502_v36, %v2561_v21 }
 0x181   : > { %1938 = vmatprep.mubr.msk.f32.mxu1 %vm685_vm0, %v2297_v45 }
 0x182   : > { %1939 = vmatmul.mubr.msk.f32.gmra.mrb[8].mxu1 %vm686_vm1, %v2297_v45 }
 0x183   : > { %v261_v20 = vpop.permute.xlu1 %260 }
 0x184   : > { %vm303_vm5 = vcmp.eq.s32.totalorder %v2502_v36, %v261_v20 }
 0x188   : > { %v421_v3 = vpop.permute.xlu1 %420 }
 0x189   : > { %vm463_vm3 = vcmp.eq.s32.totalorder %v2502_v36, %v421_v3 }
 0x18a   : > { %vm495_vm7 = vmor %vm303_vm5, %vm463_vm3  ;;  %vm658_vm3 = vcmp.eq.s32.totalorder %v2502_v36, %v622_v61  ;;  %v1319_v61 = vld [vmem:[%s3021_s1 + $0x130] sm:$0xff] }
 0x18c   : > { %v424_v4 = vpop.permute.xlu1 %423 }
 0x18d   : > { %vm464_vm2 = vcmp.eq.s32.totalorder %v2502_v36, %v424_v4 }
 0x18e   : > { %vm496_vm6 = vmor %vm304_vm4, %vm464_vm2 }
 0x18f   : > { %vm688_vm12 = vmor %vm496_vm6, %vm656_vm9 }
 0x191   : > { %v613_v12 = vpop.permute.xlu1 %612 }
 0x192   : > { %vm655_vm8 = vcmp.eq.s32.totalorder %v2502_v36, %v613_v12  ;;  %v1315_v12 = vld [vmem:[%s3021_s1 + $0x110] sm:$0xff] }
 0x193   : > { %vm687_vm10 = vmor %vm495_vm7, %vm655_vm8  ;;  %vm308_vm8 = vcmp.eq.s32.totalorder %v2502_v36, %v2565_v15 }
 0x194   : > { %1941 = vmatprep.mubr.msk.f32.mxu1 %vm687_vm10, %v2297_v45 }
 0x195   : > { %1942 = vmatmul.mubr.msk.f32.gmra.mrb[10].mxu1 %vm688_vm12, %v2297_v45 }
 0x196   : > { %v267_v10 = vpop.permute.xlu1 %266 }
 0x197   : > { %vm305_vm15 = vcmp.eq.s32.totalorder %v2502_v36, %v267_v10  ;;  %v2178_v10 = vpack.c.bf16 %v1316_v7, %v1315_v12 }
 0x199   : > { %2179 = vmatprep.subr.bf16.mxu0 %v2178_v10 }
 0x19a   : > { %2181 = vmatpush3.bf16.msra.mxu0 %v2178_v10 }
 0x19b   : > { %v427_v11 = vpop.permute.xlu1 %426 }
 0x19c   : > { %vm465_vm13 = vcmp.eq.s32.totalorder %v2502_v36, %v427_v11  ;;  %v1317_v11 = vld [vmem:[%s3021_s1 + $0x120] sm:$0xff] }
 0x19d   : > { %vm497_vm1 = vmor %vm305_vm15, %vm465_vm13  ;;  %vm660_vm13 = vcmp.eq.s32.totalorder %v2502_v36, %v628_v29 }
 0x19f   : > { %v430_v49 = vpop.permute.xlu1 %429 }
 0x1a0   : > { %vm466_vm11 = vcmp.eq.s32.totalorder %v2502_v36, %v430_v49  ;;  %v1318_v49 = vld [vmem:[%s3021_s1 + $0x128] sm:$0xff] }
 0x1a1   : > { %vm498_vm0 = vmor %vm306_vm14, %vm466_vm11 }
 0x1a2   : > { %vm690_vm5 = vmor %vm498_vm0, %vm658_vm3  ;;  %vm1559_vm0 = vcmask 64512  }
 0x1a4   : > { %v619_v16 = vpop.permute.xlu1 %618 }
 0x1a5   : > { %vm657_vm2 = vcmp.eq.s32.totalorder %v2502_v36, %v619_v16  ;;  %v2182_v16 = vpack.c.bf16 %v1318_v49, %v1317_v11  ;;  %v2875_v49 = vld [vmem:[%s3021_s1 + $0x181] ss:$0 sm:$0xff] }
 0x1a6   : > { %vm689_vm4 = vmor %vm497_vm1, %vm657_vm2 }
 0x1a7   : > { %1944 = vmatprep.mubr.msk.f32.mxu1 %vm689_vm4, %v2297_v45  ;;  %2183 = vmatprep.subr.bf16.mxu0 %v2182_v16 }
 0x1a8   : > { %1945 = vmatmul.mubr.msk.f32.gmra.mrb[12].mxu1 %vm690_vm5, %v2297_v45  ;;  %2185 = vmatpush3.bf16.msra.mxu0 %v2182_v16 }
 0x1a9   : > { %v273_v13 = vpop.permute.xlu1 %272 }
 0x1aa   : > { %vm307_vm9 = vcmp.eq.s32.totalorder %v2502_v36, %v273_v13  ;;  %v1320_v13 = vld [vmem:[%s3021_s1 + $0x138] sm:$0xff] }
 0x1ad   : > { %v1904_v14 = vpop.f32.mrb[0].mxu0 }
 0x1ae   : > { %v433_v24 = vpop.permute.xlu1 %432  ;;  %v844_v21 = vpop.f32.mrb[1].mxu0  ;;  %v850_v26 = vadd.f32 %v1904_v14, %v2781_v25  ;;  %v1321_v14 = vld [vmem:[%s3021_s1 + $0x140] sm:$0xff] }
 0x1af   : > { %vm467_vm7 = vcmp.eq.s32.totalorder %v2502_v36, %v433_v24  ;;  %v845_v5 = vadd.f32 %v2781_v25, %v844_v21  ;;  %v2186_v24 = vpack.c.bf16 %v1320_v13, %v1319_v61  ;;  %v1322_v21 = vld [vmem:[%s3021_s1 + $0x148] sm:$0xff] }
 0x1b0   : > { %vm499_vm12 = vmor %vm307_vm9, %vm467_vm7  ;;  %v1004_v31 = vmax.f32 %v850_v26, 0.0 }
 0x1b1   : > { %v1907_v18 = vpop.f32.mrb[2].mxu0  ;;  %v1003_v28 = vmax.f32 %v845_v5, 0.0  ;;  %2187 = vmatprep.subr.bf16.mxu0 %v2186_v24 }
 0x1b2   : > { %v436_v22 = vpop.permute.xlu1 %435  ;;  %v854_v23 = vpop.f32.mrb[3].mxu0  ;;  %v860_v32 = vadd.f32 %v1907_v18, %v2781_v25  ;;  %v2190_v18 = vpack.c.bf16 %v1322_v21, %v1321_v14  ;;  %2189 = vmatpush3.bf16.msra.mxu0 %v2186_v24 }
 0x1b3   : > { %vm468_vm6 = vcmp.eq.s32.totalorder %v2502_v36, %v436_v22  ;;  %v855_v15 = vadd.f32 %v2781_v25, %v854_v23  ;;  %v1323_v22 = vld [vmem:[%s3021_s1 + $0x150] sm:$0xff]  ;;  %v1324_v23 = vld [vmem:[%s3021_s1 + $0x158] sm:$0xff] }
 0x1b4   : > { %vm500_vm10 = vmor %vm308_vm8, %vm468_vm6  ;;  %v1006_v35 = vmax.f32 %v860_v32, 0.0  ;;  %2191 = vmatprep.subr.bf16.mxu0 %v2190_v18  ;;  %v1328_v32 = vld [vmem:[%s3021_s1 + $0x178] sm:$0xff] }
 0x1b5   : > { %v1910_v0 = vpop.f32.mrb[4].mxu0  ;;  %vm692_vm15 = vmor %vm500_vm10, %vm660_vm13  ;;  %v1005_v17 = vmax.f32 %v855_v15, 0.0  ;;  %v1326_v15 = vld [vmem:[%s3021_s1 + $0x168] sm:$0xff] }
 0x1b6   : > { %v864_v53 = vpop.f32.mrb[5].mxu0  ;;  %v870_v37 = vadd.f32 %v1910_v0, %v2781_v25  ;;  %v2194_v0 = vpack.c.bf16 %v1324_v23, %v1323_v22  ;;  %2193 = vmatpush3.bf16.msra.mxu0 %v2190_v18 }
 0x1b7   : > { %v625_v63 = vpop.permute.xlu1 %624 }
 0x1b8   : > { %vm659_vm11 = vcmp.eq.s32.totalorder %v2502_v36, %v625_v63  ;;  %v865_v36 = vadd.f32 %v2781_v25, %v864_v53  ;;  %2195 = vmatprep.subr.bf16.mxu0 %v2194_v0 }
 0x1b9   : > { %vm691_vm14 = vmor %vm499_vm12, %vm659_vm11  ;;  %v1913_v27 = vpop.f32.mrb[6].mxu0 }
 0x1ba   : > { %v874_v30 = vpop.f32.mrb[7].mxu0  ;;  %1947 = vmatprep.mubr.msk.f32.mxu1 %vm691_vm14, %v2297_v45  ;;  %v1007_v34 = vmax.f32 %v865_v36, 0.0  ;;  %v880_v40 = vadd.f32 %v1913_v27, %v2781_v25  ;;  %2197 = vmatpush3.bf16.msra.mxu0 %v2194_v0 }
 0x1bb   : > { %1948 = vmatmul.mubr.msk.f32.gmra.mrb[14].mxu1 %vm692_vm15, %v2297_v45  ;;  %v875_v38 = vadd.f32 %v2781_v25, %v874_v30  ;;  %v1008_v45 = vmax.f32 %v870_v37, 0.0 }
 0x1bc   : > { %1982 = vmatprep.mubr.f32.mxu1 %v1003_v28  ;;  %v1010_v43 = vmax.f32 %v880_v40, 0.0  ;;  %v1325_v28 = vld [vmem:[%s3021_s1 + $0x160] sm:$0xff] }
 0x1bd   : > { %v1916_v33 = vpop.f32.mrb[8].mxu0  ;;  %v1009_v41 = vmax.f32 %v875_v38, 0.0  ;;  %v2198_v30 = vpack.c.bf16 %v1326_v15, %v1325_v28 }
 0x1be   : > { %v884_v8 = vpop.f32.mrb[9].mxu0  ;;  %v890_v46 = vadd.f32 %v1916_v33, %v2781_v25 }
 0x1bf   : > { %1983 = vmatmul.mubr.f32.vlgmr.msra.gmra.mrb[16].mxu1 %v1004_v31  ;;  %v885_v42 = vadd.f32 %v2781_v25, %v884_v8  ;;  %2199 = vmatprep.subr.bf16.mxu0 %v2198_v30  ;;  %v1327_v31 = vld [vmem:[%s3021_s1 + $0x170] sm:$0xff] }
 0x1c0   : > { %1985 = vmatprep.mubr.f32.mxu1 %v1005_v17  ;;  %v1012_v47 = vmax.f32 %v890_v46, 0.0  ;;  %2201 = vmatpush3.bf16.msra.mxu0 %v2198_v30  ;;  %v2202_v33 = vpack.c.bf16 %v1328_v32, %v1327_v31 }
 0x1c1   : > { %v1011_v2 = vmax.f32 %v885_v42, 0.0 }
 0x1c2   : > { %2203 = vmatprep.subr.bf16.mxu0 %v2202_v33 }
 0x1c3   : > { %1986 = vmatmul.mubr.f32.gmra.mrb[18].mxu1 %v1006_v35 }
 0x1c4   : > { %1988 = vmatprep.mubr.f32.mxu1 %v1007_v34  ;;  %2205 = vmatpush3.bf16.msra.mxu0 %v2202_v33 }
 0x1c7   : > { %1989 = vmatmul.mubr.f32.gmra.mrb[20].mxu1 %v1008_v45 }
 0x1c8   : > { %1991 = vmatprep.mubr.f32.mxu1 %v1009_v41 }
 0x1cb   : > { %1992 = vmatmul.mubr.f32.gmra.mrb[22].mxu1 %v1010_v43 }
 0x1cc   : > { %1994 = vmatprep.mubr.f32.mxu1 %v1011_v2 }
 0x1cf   : > { %1995 = vmatmul.mubr.f32.gmra.mrb[24].mxu1 %v1012_v47 }
 0x1d0   : > { %v1919_v19 = vpop.f32.mrb[10].mxu0 }
 0x1d1   : > { %v900_v48 = vadd.f32 %v1919_v19, %v2781_v25  ;;  %v894_v39 = vpop.f32.mrb[11].mxu0 }
 0x1d2   : > { %v895_v50 = vadd.f32 %v2781_v25, %v894_v39 }
 0x1d3   : > { %v1014_v52 = vmax.f32 %v900_v48, 0.0 }
 0x1d4   : > { %v1013_v51 = vmax.f32 %v895_v50, 0.0 }
 0x1d6   : > { %1997 = vmatprep.mubr.f32.mxu1 %v1013_v51 }
 0x1d7   : > { %1998 = vmatmul.mubr.f32.gmra.mrb[26].mxu1 %v1014_v52 }
 0x1e3   : > { %v1922_v54 = vpop.f32.mrb[12].mxu0 }
 0x1e4   : > { %v910_v55 = vadd.f32 %v1922_v54, %v2781_v25  ;;  %v904_v56 = vpop.f32.mrb[13].mxu0 }
 0x1e5   : > { %v905_v57 = vadd.f32 %v2781_v25, %v904_v56 }
 0x1e6   : > { %v1016_v6 = vmax.f32 %v910_v55, 0.0 }
 0x1e7   : > { %v1015_v59 = vmax.f32 %v905_v57, 0.0 }
 0x1e9   : > { %2000 = vmatprep.mubr.f32.mxu1 %v1015_v59 }
 0x1ea   : > { %2001 = vmatmul.mubr.f32.gmra.mrb[28].mxu1 %v1016_v6 }
 0x1f6   : > { %v1925_v62 = vpop.f32.mrb[14].mxu0 }
 0x1f7   : > { %v920_v9 = vadd.f32 %v1925_v62, %v2781_v25  ;;  %v914_v1 = vpop.f32.mrb[15].mxu0 }
 0x1f8   : > { %v915_v20 = vadd.f32 %v2781_v25, %v914_v1 }
 0x1f9   : > { %v1018_v4 = vmax.f32 %v920_v9, 0.0 }
 0x1fa   : > { %v1017_v3 = vmax.f32 %v915_v20, 0.0 }
 0x1fc   : > { %2003 = vmatprep.mubr.f32.mxu1 %v1017_v3 }
 0x1fd   : > { %2004 = vmatmul.mubr.f32.gmra.mrb[30].mxu1 %v1018_v4 }
 0x209   : > { %v1928_v29 = vpop.f32.mrb[0].mxu1 }
 0x20a   : > { %v930_v5 = vadd.f32 %v1928_v29, %v2781_v25  ;;  %v924_v53 = vpop.f32.mrb[1].mxu1 }
 0x20b   : > { %v925_v63 = vadd.f32 %v2781_v25, %v924_v53 }
 0x20c   : > { %v1020_v27 = vmax.f32 %v930_v5, 0.0 }
 0x20d   : > { %v1019_v26 = vmax.f32 %v925_v63, 0.0 }
 0x20f   : > { %2006 = vmatprep.mubr.f32.mxu1 %v1019_v26 }
 0x210   : > { %2007 = vmatmul.mubr.f32.gmra.mrb[32].mxu1 %v1020_v27 }
 0x21c   : > { %v1931_v17 = vpop.f32.mrb[2].mxu1 }
 0x21d   : > { %v940_v36 = vadd.f32 %v1931_v17, %v2781_v25  ;;  %v934_v8 = vpop.f32.mrb[3].mxu1 }
 0x21e   : > { %v935_v35 = vadd.f32 %v2781_v25, %v934_v8 }
 0x21f   : > { %v1022_v34 = vmax.f32 %v940_v36, 0.0 }
 0x220   : > { %v1021_v37 = vmax.f32 %v935_v35, 0.0 }
 0x222   : > { %2009 = vmatprep.mubr.f32.mxu1 %v1021_v37 }
 0x223   : > { %2010 = vmatmul.mubr.f32.gmra.mrb[34].mxu1 %v1022_v34 }
 0x22f   : > { %v1934_v38 = vpop.f32.mrb[4].mxu1 }
 0x230   : > { %v950_v45 = vadd.f32 %v1934_v38, %v2781_v25  ;;  %v944_v40 = vpop.f32.mrb[5].mxu1 }
 0x231   : > { %v945_v41 = vadd.f32 %v2781_v25, %v944_v40 }
 0x232   : > { %v1024_v43 = vmax.f32 %v950_v45, 0.0 }
 0x233   : > { %v1023_v42 = vmax.f32 %v945_v41, 0.0 }
 0x235   : > { %2012 = vmatprep.mubr.f32.mxu1 %v1023_v42 }
 0x236   : > { %2013 = vmatmul.mubr.f32.gmra.mrb[36].mxu1 %v1024_v43 }
 0x242   : > { %v1937_v46 = vpop.f32.mrb[6].mxu1 }
 0x243   : > { %v960_v2 = vadd.f32 %v1937_v46, %v2781_v25  ;;  %v954_v47 = vpop.f32.mrb[7].mxu1 }
 0x244   : > { %v955_v19 = vadd.f32 %v2781_v25, %v954_v47 }
 0x245   : > { %v1026_v39 = vmax.f32 %v960_v2, 0.0 }
 0x246   : > { %v1025_v48 = vmax.f32 %v955_v19, 0.0 }
 0x248   : > { %2015 = vmatprep.mubr.f32.mxu1 %v1025_v48 }
 0x249   : > { %2016 = vmatmul.mubr.f32.gmra.mrb[38].mxu1 %v1026_v39 }
 0x255   : > { %v1940_v50 = vpop.f32.mrb[8].mxu1 }
 0x256   : > { %v970_v51 = vadd.f32 %v1940_v50, %v2781_v25  ;;  %v964_v52 = vpop.f32.mrb[9].mxu1 }
 0x257   : > { %v965_v54 = vadd.f32 %v2781_v25, %v964_v52 }
 0x258   : > { %v1028_v56 = vmax.f32 %v970_v51, 0.0 }
 0x259   : > { %v1027_v55 = vmax.f32 %v965_v54, 0.0 }
 0x25b   : > { %2018 = vmatprep.mubr.f32.mxu1 %v1027_v55 }
 0x25c   : > { %2019 = vmatmul.mubr.f32.gmra.mrb[40].mxu1 %v1028_v56 }
 0x268   : > { %v1943_v57 = vpop.f32.mrb[10].mxu1 }
 0x269   : > { %v980_v59 = vadd.f32 %v1943_v57, %v2781_v25  ;;  %v974_v6 = vpop.f32.mrb[11].mxu1 }
 0x26a   : > { %v975_v44 = vadd.f32 %v2781_v25, %v974_v6 }
 0x26b   : > { %v1030_v60 = vmax.f32 %v980_v59, 0.0 }
 0x26c   : > { %v1029_v58 = vmax.f32 %v975_v44, 0.0 }
 0x26e   : > { %2021 = vmatprep.mubr.f32.mxu1 %v1029_v58 }
 0x26f   : > { %2022 = vmatmul.mubr.f32.gmra.mrb[42].mxu1 %v1030_v60 }
 0x27b   : > { %v1946_v62 = vpop.f32.mrb[12].mxu1 }
 0x27c   : > { %v990_v9 = vadd.f32 %v1946_v62, %v2781_v25  ;;  %v984_v1 = vpop.f32.mrb[13].mxu1 }
 0x27d   : > { %v985_v20 = vadd.f32 %v2781_v25, %v984_v1 }
 0x27e   : > { %v1032_v4 = vmax.f32 %v990_v9, 0.0 }
 0x27f   : > { %v1031_v3 = vmax.f32 %v985_v20, 0.0 }
 0x281   : > { %2024 = vmatprep.mubr.f32.mxu1 %v1031_v3 }
 0x282   : > { %2025 = vmatmul.mubr.f32.gmra.mrb[44].mxu1 %v1032_v4 }
 0x28e   : > { %v1949_v12 = vpop.f32.mrb[14].mxu1 }
 0x28f   : > { %v1000_v7 = vadd.f32 %v1949_v12, %v2781_v25  ;;  %v994_v10 = vpop.f32.mrb[15].mxu1 }
 0x290   : > { %v995_v11 = vadd.f32 %v2781_v25, %v994_v10 }
 0x291   : > { %v1034_v13 = vmax.f32 %v1000_v7, 0.0 }
 0x292   : > { %v1033_v16 = vmax.f32 %v995_v11, 0.0  ;;  %v1984_v61 = vpop.f32.mrb[16].mxu1 }
 0x293   : > { %v1128_v14 = vadd.f32 %v1984_v61, %v2875_v49  ;;  %v1122_v24 = vpop.f32.mrb[17].mxu1 }
 0x294   : > { %v1123_v21 = vadd.f32 %v2875_v49, %v1122_v24  ;;  %2027 = vmatprep.mubr.f32.mxu1 %v1033_v16 }
 0x295   : > { %2028 = vmatmul.mubr.f32.gmra.mrb[46].mxu1 %v1034_v13  ;;  %v1282_v23 = vmax.f32 %v1128_v14, 0.0 }
 0x296   : > { %v1281_v18 = vmax.f32 %v1123_v21, 0.0  ;;  %v1987_v22 = vpop.f32.mrb[18].mxu1 }
 0x297   : > { %v1138_v25 = vadd.f32 %v1987_v22, %v2875_v49  ;;  %v1132_v0 = vpop.f32.mrb[19].mxu1 }
 0x298   : > { %v1133_v29 = vadd.f32 %v2875_v49, %v1132_v0  ;;  %2062 = vmatprep.mubr.f32.mxu0 %v1281_v18 }
 0x299   : > { %2063 = vmatmul.mubr.f32.vlgmr.msra.gmra.mrb[16].mxu0 %v1282_v23  ;;  %v1284_v63 = vmax.f32 %v1138_v25, 0.0 }
 0x29a   : > { %v1283_v5 = vmax.f32 %v1133_v29, 0.0  ;;  %v1990_v53 = vpop.f32.mrb[20].mxu1 }
 0x29b   : > { %v1148_v26 = vadd.f32 %v1990_v53, %v2875_v49  ;;  %v1142_v27 = vpop.f32.mrb[21].mxu1 }
 0x29c   : > { %v1143_v28 = vadd.f32 %v2875_v49, %v1142_v27  ;;  %2065 = vmatprep.mubr.f32.mxu0 %v1283_v5 }
 0x29d   : > { %2066 = vmatmul.mubr.f32.gmra.mrb[18].mxu0 %v1284_v63  ;;  %v1286_v31 = vmax.f32 %v1148_v26, 0.0 }
 0x29e   : > { %v1285_v15 = vmax.f32 %v1143_v28, 0.0  ;;  %v1993_v30 = vpop.f32.mrb[22].mxu1 }
 0x29f   : > { %v1158_v32 = vadd.f32 %v1993_v30, %v2875_v49  ;;  %v1152_v33 = vpop.f32.mrb[23].mxu1 }
 0x2a0   : > { %v1153_v17 = vadd.f32 %v2875_v49, %v1152_v33  ;;  %2068 = vmatprep.mubr.f32.mxu0 %v1285_v15 }
 0x2a1   : > { %2069 = vmatmul.mubr.f32.gmra.mrb[20].mxu0 %v1286_v31  ;;  %v1288_v35 = vmax.f32 %v1158_v32, 0.0 }
 0x2a2   : > { %v1287_v36 = vmax.f32 %v1153_v17, 0.0  ;;  %v1996_v8 = vpop.f32.mrb[24].mxu1 }
 0x2a3   : > { %v1168_v37 = vadd.f32 %v1996_v8, %v2875_v49  ;;  %v1162_v34 = vpop.f32.mrb[25].mxu1 }
 0x2a4   : > { %v1163_v38 = vadd.f32 %v2875_v49, %v1162_v34  ;;  %2071 = vmatprep.mubr.f32.mxu0 %v1287_v36 }
 0x2a5   : > { %2072 = vmatmul.mubr.f32.gmra.mrb[22].mxu0 %v1288_v35  ;;  %v1290_v40 = vmax.f32 %v1168_v37, 0.0 }
 0x2a6   : > { %v1289_v45 = vmax.f32 %v1163_v38, 0.0 }
 0x2a8   : > { %2074 = vmatprep.mubr.f32.mxu0 %v1289_v45 }
 0x2a9   : > { %2075 = vmatmul.mubr.f32.gmra.mrb[24].mxu0 %v1290_v40 }
 0x2aa   : > { %v1999_v41 = vpop.f32.mrb[26].mxu1 }
 0x2ab   : > { %v1178_v42 = vadd.f32 %v1999_v41, %v2875_v49  ;;  %v1172_v43 = vpop.f32.mrb[27].mxu1 }
 0x2ac   : > { %v1173_v46 = vadd.f32 %v2875_v49, %v1172_v43 }
 0x2ad   : > { %v1292_v47 = vmax.f32 %v1178_v42, 0.0  ;;  %v2912_v42 = vld [vmem:[%s3021_s1 + $0x182] ss:$0 sm:$0xff] }
 0x2ae   : > { %v1291_v2 = vmax.f32 %v1173_v46, 0.0 }
 0x2b0   : > { %2077 = vmatprep.mubr.f32.mxu0 %v1291_v2 }
 0x2b1   : > { %2078 = vmatmul.mubr.f32.gmra.mrb[26].mxu0 %v1292_v47 }
 0x2bd   : > { %v2002_v19 = vpop.f32.mrb[28].mxu1 }
 0x2be   : > { %v1188_v48 = vadd.f32 %v2002_v19, %v2875_v49  ;;  %v1182_v39 = vpop.f32.mrb[29].mxu1 }
 0x2bf   : > { %v1183_v50 = vadd.f32 %v2875_v49, %v1182_v39 }
 0x2c0   : > { %v1294_v52 = vmax.f32 %v1188_v48, 0.0 }
 0x2c1   : > { %v1293_v51 = vmax.f32 %v1183_v50, 0.0 }
 0x2c3   : > { %2080 = vmatprep.mubr.f32.mxu0 %v1293_v51 }
 0x2c4   : > { %2081 = vmatmul.mubr.f32.gmra.mrb[28].mxu0 %v1294_v52 }
 0x2d0   : > { %v2005_v54 = vpop.f32.mrb[30].mxu1 }
 0x2d1   : > { %v1198_v55 = vadd.f32 %v2005_v54, %v2875_v49  ;;  %v1192_v56 = vpop.f32.mrb[31].mxu1 }
 0x2d2   : > { %v1193_v57 = vadd.f32 %v2875_v49, %v1192_v56 }
 0x2d3   : > { %v1296_v6 = vmax.f32 %v1198_v55, 0.0 }
 0x2d4   : > { %v1295_v59 = vmax.f32 %v1193_v57, 0.0 }
 0x2d6   : > { %2083 = vmatprep.mubr.f32.mxu0 %v1295_v59 }
 0x2d7   : > { %2084 = vmatmul.mubr.f32.gmra.mrb[30].mxu0 %v1296_v6 }
 0x2e3   : > { %v2008_v44 = vpop.f32.mrb[32].mxu1 }
 0x2e4   : > { %v1208_v58 = vadd.f32 %v2008_v44, %v2875_v49  ;;  %v1202_v60 = vpop.f32.mrb[33].mxu1 }
 0x2e5   : > { %v1203_v62 = vadd.f32 %v2875_v49, %v1202_v60 }
 0x2e6   : > { %v1298_v1 = vmax.f32 %v1208_v58, 0.0 }
 0x2e7   : > { %v1297_v9 = vmax.f32 %v1203_v62, 0.0 }
 0x2e9   : > { %2086 = vmatprep.mubr.f32.mxu0 %v1297_v9 }
 0x2ea   : > { %2087 = vmatmul.mubr.f32.gmra.mrb[32].mxu0 %v1298_v1 }
 0x2f6   : > { %v2011_v20 = vpop.f32.mrb[34].mxu1 }
 0x2f7   : > { %v1218_v3 = vadd.f32 %v2011_v20, %v2875_v49  ;;  %v1212_v4 = vpop.f32.mrb[35].mxu1 }
 0x2f8   : > { %v1213_v12 = vadd.f32 %v2875_v49, %v1212_v4 }
 0x2f9   : > { %v1300_v10 = vmax.f32 %v1218_v3, 0.0 }
 0x2fa   : > { %v1299_v7 = vmax.f32 %v1213_v12, 0.0 }
 0x2fc   : > { %2089 = vmatprep.mubr.f32.mxu0 %v1299_v7 }
 0x2fd   : > { %2090 = vmatmul.mubr.f32.gmra.mrb[34].mxu0 %v1300_v10 }
 0x309   : > { %v2014_v11 = vpop.f32.mrb[36].mxu1 }
 0x30a   : > { %v1228_v16 = vadd.f32 %v2014_v11, %v2875_v49  ;;  %v1222_v61 = vpop.f32.mrb[37].mxu1 }
 0x30b   : > { %v1223_v13 = vadd.f32 %v2875_v49, %v1222_v61 }
 0x30c   : > { %v1302_v24 = vmax.f32 %v1228_v16, 0.0 }
 0x30d   : > { %v1301_v14 = vmax.f32 %v1223_v13, 0.0 }
 0x30f   : > { %2092 = vmatprep.mubr.f32.mxu0 %v1301_v14 }
 0x310   : > { %2093 = vmatmul.mubr.f32.gmra.mrb[36].mxu0 %v1302_v24 }
 0x31c   : > { %v2017_v21 = vpop.f32.mrb[38].mxu1 }
 0x31d   : > { %v1238_v18 = vadd.f32 %v2017_v21, %v2875_v49  ;;  %v1232_v22 = vpop.f32.mrb[39].mxu1 }
 0x31e   : > { %v1233_v23 = vadd.f32 %v2875_v49, %v1232_v22 }
 0x31f   : > { %v1304_v0 = vmax.f32 %v1238_v18, 0.0 }
 0x320   : > { %v1303_v25 = vmax.f32 %v1233_v23, 0.0 }
 0x322   : > { %2095 = vmatprep.mubr.f32.mxu0 %v1303_v25 }
 0x323   : > { %2096 = vmatmul.mubr.f32.gmra.mrb[38].mxu0 %v1304_v0 }
 0x32f   : > { %v2020_v29 = vpop.f32.mrb[40].mxu1 }
 0x330   : > { %v1248_v5 = vadd.f32 %v2020_v29, %v2875_v49  ;;  %v1242_v53 = vpop.f32.mrb[41].mxu1 }
 0x331   : > { %v1243_v63 = vadd.f32 %v2875_v49, %v1242_v53 }
 0x332   : > { %v1306_v27 = vmax.f32 %v1248_v5, 0.0 }
 0x333   : > { %v1305_v26 = vmax.f32 %v1243_v63, 0.0 }
 0x335   : > { %2098 = vmatprep.mubr.f32.mxu0 %v1305_v26 }
 0x336   : > { %2099 = vmatmul.mubr.f32.gmra.mrb[40].mxu0 %v1306_v27 }
 0x342   : > { %v2023_v28 = vpop.f32.mrb[42].mxu1 }
 0x343   : > { %v1258_v15 = vadd.f32 %v2023_v28, %v2875_v49  ;;  %v1252_v30 = vpop.f32.mrb[43].mxu1 }
 0x344   : > { %v1253_v31 = vadd.f32 %v2875_v49, %v1252_v30 }
 0x345   : > { %v1308_v33 = vmax.f32 %v1258_v15, 0.0 }
 0x346   : > { %v1307_v32 = vmax.f32 %v1253_v31, 0.0 }
 0x348   : > { %2101 = vmatprep.mubr.f32.mxu0 %v1307_v32 }
 0x349   : > { %2102 = vmatmul.mubr.f32.gmra.mrb[42].mxu0 %v1308_v33 }
 0x355   : > { %v2026_v17 = vpop.f32.mrb[44].mxu1 }
 0x356   : > { %v1268_v36 = vadd.f32 %v2026_v17, %v2875_v49  ;;  %v1262_v8 = vpop.f32.mrb[45].mxu1 }
 0x357   : > { %v1263_v35 = vadd.f32 %v2875_v49, %v1262_v8 }
 0x358   : > { %v1310_v34 = vmax.f32 %v1268_v36, 0.0 }
 0x359   : > { %v1309_v37 = vmax.f32 %v1263_v35, 0.0 }
 0x35b   : > { %2104 = vmatprep.mubr.f32.mxu0 %v1309_v37 }
 0x35c   : > { %2105 = vmatmul.mubr.f32.gmra.mrb[44].mxu0 %v1310_v34 }
 0x368   : > { %v2029_v38 = vpop.f32.mrb[46].mxu1 }
 0x369   : > { %v1278_v45 = vadd.f32 %v2029_v38, %v2875_v49  ;;  %v1272_v40 = vpop.f32.mrb[47].mxu1 }
 0x36a   : > { %v1273_v41 = vadd.f32 %v2875_v49, %v1272_v40 }
 0x36b   : > { %v1312_v2 = vmax.f32 %v1278_v45, 0.0 }
 0x36c   : > { %v1311_v43 = vmax.f32 %v1273_v41, 0.0  ;;  %v2064_v46 = vpop.f32.mrb[16].mxu0 }
 0x36d   : > { %v1406_v49 = vadd.f32 %v2064_v46, %v2912_v42  ;;  %v1400_v47 = vpop.f32.mrb[17].mxu0 }
 0x36e   : > { %v1401_v19 = vadd.f32 %v2912_v42, %v1400_v47  ;;  %2107 = vmatprep.mubr.f32.mxu0 %v1311_v43 }
 0x36f   : > { %1561 = vst.msk [vmem:[%s2919_s21 + $0x8] sm:$0xff] %vm1559_vm0, %v1406_v49  ;;  %2108 = vmatmul.mubr.f32.gmra.mrb[46].mxu0 %v1312_v2 }
 0x370   : > { %1560 = vst.msk [vmem:[%s2919_s21] sm:$0xff] %vm1559_vm0, %v1401_v19  ;;  %v2067_v48 = vpop.f32.mrb[18].mxu0 }
 0x371   : > { %v1416_v39 = vadd.f32 %v2067_v48, %v2912_v42  ;;  %v1410_v50 = vpop.f32.mrb[19].mxu0 }
 0x372   : > { %v1411_v51 = vadd.f32 %v2912_v42, %v1410_v50 }
 0x373   : > { %1563 = vst.msk [vmem:[%s2919_s21 + $0x18] sm:$0xff] %vm1559_vm0, %v1416_v39 }
 0x374   : > { %1562 = vst.msk [vmem:[%s2919_s21 + $0x10] sm:$0xff] %vm1559_vm0, %v1411_v51  ;;  %v2070_v52 = vpop.f32.mrb[20].mxu0 }
 0x375   : > { %v1426_v54 = vadd.f32 %v2070_v52, %v2912_v42  ;;  %v1420_v55 = vpop.f32.mrb[21].mxu0 }
 0x376   : > { %v1421_v56 = vadd.f32 %v2912_v42, %v1420_v55 }
 0x377   : > { %1565 = vst.msk [vmem:[%s2919_s21 + $0x28] sm:$0xff] %vm1559_vm0, %v1426_v54 }
 0x378   : > { %1564 = vst.msk [vmem:[%s2919_s21 + $0x20] sm:$0xff] %vm1559_vm0, %v1421_v56  ;;  %v2073_v57 = vpop.f32.mrb[22].mxu0 }
 0x379   : > { %v1436_v59 = vadd.f32 %v2073_v57, %v2912_v42  ;;  %v1430_v6 = vpop.f32.mrb[23].mxu0 }
 0x37a   : > { %v1431_v44 = vadd.f32 %v2912_v42, %v1430_v6 }
 0x37b   : > { %1567 = vst.msk [vmem:[%s2919_s21 + $0x38] sm:$0xff] %vm1559_vm0, %v1436_v59 }
 0x37c   : > { %1566 = vst.msk [vmem:[%s2919_s21 + $0x30] sm:$0xff] %vm1559_vm0, %v1431_v44  ;;  %v2076_v58 = vpop.f32.mrb[24].mxu0 }
 0x37d   : > { %v1446_v60 = vadd.f32 %v2076_v58, %v2912_v42  ;;  %v1440_v62 = vpop.f32.mrb[25].mxu0 }
 0x37e   : > { %v1441_v9 = vadd.f32 %v2912_v42, %v1440_v62 }
 0x37f   : > { %1569 = vst.msk [vmem:[%s2919_s21 + $0x48] sm:$0xff] %vm1559_vm0, %v1446_v60 }
 0x380   : > { %1568 = vst.msk [vmem:[%s2919_s21 + $0x40] sm:$0xff] %vm1559_vm0, %v1441_v9 }
 0x384   : > { %v2079_v1 = vpop.f32.mrb[26].mxu0 }
 0x385   : > { %v1456_v20 = vadd.f32 %v2079_v1, %v2912_v42  ;;  %v1450_v3 = vpop.f32.mrb[27].mxu0 }
 0x386   : > { %v1451_v4 = vadd.f32 %v2912_v42, %v1450_v3 }
 0x387   : > { %1571 = vst.msk [vmem:[%s2919_s21 + $0x58] sm:$0xff] %vm1559_vm0, %v1456_v20 }
 0x388   : > { %1570 = vst.msk [vmem:[%s2919_s21 + $0x50] sm:$0xff] %vm1559_vm0, %v1451_v4 }
 0x397   : > { %v2082_v12 = vpop.f32.mrb[28].mxu0 }
 0x398   : > { %v1466_v7 = vadd.f32 %v2082_v12, %v2912_v42  ;;  %v1460_v10 = vpop.f32.mrb[29].mxu0 }
 0x399   : > { %v1461_v11 = vadd.f32 %v2912_v42, %v1460_v10 }
 0x39a   : > { %1573 = vst.msk [vmem:[%s2919_s21 + $0x68] sm:$0xff] %vm1559_vm0, %v1466_v7 }
 0x39b   : > { %1572 = vst.msk [vmem:[%s2919_s21 + $0x60] sm:$0xff] %vm1559_vm0, %v1461_v11 }
 0x3aa   : > { %v2085_v16 = vpop.f32.mrb[30].mxu0 }
 0x3ab   : > { %v1476_v61 = vadd.f32 %v2085_v16, %v2912_v42  ;;  %v1470_v13 = vpop.f32.mrb[31].mxu0 }
 0x3ac   : > { %v1471_v14 = vadd.f32 %v2912_v42, %v1470_v13 }
 0x3ad   : > { %1575 = vst.msk [vmem:[%s2919_s21 + $0x78] sm:$0xff] %vm1559_vm0, %v1476_v61 }
 0x3ae   : > { %1574 = vst.msk [vmem:[%s2919_s21 + $0x70] sm:$0xff] %vm1559_vm0, %v1471_v14 }
 0x3bd   : > { %v2088_v24 = vpop.f32.mrb[32].mxu0 }
 0x3be   : > { %v1486_v21 = vadd.f32 %v2088_v24, %v2912_v42  ;;  %v1480_v18 = vpop.f32.mrb[33].mxu0 }
 0x3bf   : > { %v1481_v22 = vadd.f32 %v2912_v42, %v1480_v18 }
 0x3c0   : > { %1577 = vst.msk [vmem:[%s2919_s21 + $0x88] sm:$0xff] %vm1559_vm0, %v1486_v21 }
 0x3c1   : > { %1576 = vst.msk [vmem:[%s2919_s21 + $0x80] sm:$0xff] %vm1559_vm0, %v1481_v22 }
 0x3d0   : > { %v2091_v23 = vpop.f32.mrb[34].mxu0 }
 0x3d1   : > { %v1496_v25 = vadd.f32 %v2091_v23, %v2912_v42  ;;  %v1490_v0 = vpop.f32.mrb[35].mxu0 }
 0x3d2   : > { %v1491_v29 = vadd.f32 %v2912_v42, %v1490_v0 }
 0x3d3   : > { %1579 = vst.msk [vmem:[%s2919_s21 + $0x98] sm:$0xff] %vm1559_vm0, %v1496_v25 }
 0x3d4   : > { %1578 = vst.msk [vmem:[%s2919_s21 + $0x90] sm:$0xff] %vm1559_vm0, %v1491_v29 }
 0x3e3   : > { %v2094_v5 = vpop.f32.mrb[36].mxu0 }
 0x3e4   : > { %v1506_v53 = vadd.f32 %v2094_v5, %v2912_v42  ;;  %v1500_v63 = vpop.f32.mrb[37].mxu0 }
 0x3e5   : > { %v1501_v26 = vadd.f32 %v2912_v42, %v1500_v63 }
 0x3e6   : > { %1581 = vst.msk [vmem:[%s2919_s21 + $0xa8] sm:$0xff] %vm1559_vm0, %v1506_v53 }
 0x3e7   : > { %1580 = vst.msk [vmem:[%s2919_s21 + $0xa0] sm:$0xff] %vm1559_vm0, %v1501_v26 }
 0x3f6   : > { %v2097_v27 = vpop.f32.mrb[38].mxu0 }
 0x3f7   : > { %v1516_v28 = vadd.f32 %v2097_v27, %v2912_v42  ;;  %v1510_v15 = vpop.f32.mrb[39].mxu0 }
 0x3f8   : > { %v1511_v30 = vadd.f32 %v2912_v42, %v1510_v15 }
 0x3f9   : > { %1583 = vst.msk [vmem:[%s2919_s21 + $0xb8] sm:$0xff] %vm1559_vm0, %v1516_v28 }
 0x3fa   : > { %1582 = vst.msk [vmem:[%s2919_s21 + $0xb0] sm:$0xff] %vm1559_vm0, %v1511_v30 }
 0x409   : > { %v2100_v31 = vpop.f32.mrb[40].mxu0 }
 0x40a   : > { %v1526_v32 = vadd.f32 %v2100_v31, %v2912_v42  ;;  %v1520_v33 = vpop.f32.mrb[41].mxu0 }
 0x40b   : > { %v1521_v17 = vadd.f32 %v2912_v42, %v1520_v33 }
 0x40c   : > { %1585 = vst.msk [vmem:[%s2919_s21 + $0xc8] sm:$0xff] %vm1559_vm0, %v1526_v32 }
 0x40d   : > { %1584 = vst.msk [vmem:[%s2919_s21 + $0xc0] sm:$0xff] %vm1559_vm0, %v1521_v17 }
 0x41c   : > { %v2103_v36 = vpop.f32.mrb[42].mxu0 }
 0x41d   : > { %v1536_v8 = vadd.f32 %v2103_v36, %v2912_v42  ;;  %v1530_v35 = vpop.f32.mrb[43].mxu0 }
 0x41e   : > { %v1531_v37 = vadd.f32 %v2912_v42, %v1530_v35 }
 0x41f   : > { %1587 = vst.msk [vmem:[%s2919_s21 + $0xd8] sm:$0xff] %vm1559_vm0, %v1536_v8 }
 0x420   : > { %1586 = vst.msk [vmem:[%s2919_s21 + $0xd0] sm:$0xff] %vm1559_vm0, %v1531_v37 }
 0x42f   : > { %v2106_v34 = vpop.f32.mrb[44].mxu0 }
 0x430   : > { %v1546_v38 = vadd.f32 %v2106_v34, %v2912_v42  ;;  %v1540_v45 = vpop.f32.mrb[45].mxu0 }
 0x431   : > { %v1541_v40 = vadd.f32 %v2912_v42, %v1540_v45 }
 0x432   : > { %1589 = vst.msk [vmem:[%s2919_s21 + $0xe8] sm:$0xff] %vm1559_vm0, %v1546_v38 }
 0x433   : > { %1588 = vst.msk [vmem:[%s2919_s21 + $0xe0] sm:$0xff] %vm1559_vm0, %v1541_v40 }
 0x442   : > { %v2109_v41 = vpop.f32.mrb[46].mxu0 }
 0x443   : > { %v1556_v43 = vadd.f32 %v2109_v41, %v2912_v42  ;;  %v1550_v46 = vpop.f32.mrb[47].mxu0 }
 0x444   : > { %v1551_v2 = vadd.f32 %v2912_v42, %v1550_v46 }
 0x445   : > { %1591 = vst.msk [vmem:[%s2919_s21 + $0xf8] sm:$0xff] %vm1559_vm0, %v1556_v43 }
 0x446   : > { %1590 = vst.msk [vmem:[%s2919_s21 + $0xf0] sm:$0xff] %vm1559_vm0, %v1551_v2 }
 0x447 PF: > { %s12_s9 = sadd.s32 1, %s2292_s9  }
 0x448   : > { %p9_p4 = scmp.ge.s32.totalorder %s12_s9, 6  }
 0x44a   :  { %11 = sbr.rel (!%p9_p4) target bundleno = 1 (0x1), region = 58 }

</bundles_post_ra>
